<compile_context>
chip_gen: v6e
topology: v6e:2x2x1
jax: 0.10.0
libtpu: 0.0.40
codegen_flags: <defaults>
</compile_context>

<pallas_src>
import jax
import jax.numpy as jnp
import numpy as np
from jax.experimental import pallas as pl
from jax.experimental.pallas import tpu as pltpu

ASZ = 50        # attention size (fixed in the PyTorch module)
GATE_PAD = 128  # per-gate column padding (lane-tile aligned)


# ----------------------------------------------------------------- kernel ---
def _splanner_kernel(
    hx_ref,        # (B, hsz)
    keys_ref,      # (B, Nk, hsz)
    mask_ref,      # (B, T, K) f32  per-step mask schedule (>0 means masked)
    emb_ref,       # (3, A)
    clin_wT_ref,   # (hsz, A)
    clin_b_ref,    # (1, A)
    klin_wT_ref,   # (hsz, A)
    klin_b_ref,    # (1, A)
    w_ih_ref,      # (A, 3*GATE_PAD)  gate j lives in columns [j*GP, j*GP+A)
    b_ih_ref,      # (1, 3*GATE_PAD)
    w_hh_ref,      # (A, 3*GATE_PAD)
    b_hh_ref,      # (1, 3*GATE_PAD)
    out_ref,       # (B, T, K)
):
    B, T, K = out_ref.shape
    Nk = keys_ref.shape[1]
    hsz = keys_ref.shape[2]
    A = ASZ
    GP = GATE_PAD
    NEG = jnp.float32(-1e30)   # finite "masked" score: exp underflows to exactly 0,
                               # but a fully-masked row cannot produce NaN.

    # ---- projections (done once, fused into the same launch) ----------------
    hx = (jnp.dot(hx_ref[...], clin_wT_ref[...],
                  preferred_element_type=jnp.float32) + clin_b_ref[...])        # (B, A)

    keys2d = keys_ref[...].reshape(B * Nk, hsz)
    keys_p = (jnp.dot(keys2d, klin_wT_ref[...],
                      preferred_element_type=jnp.float32)
              + klin_b_ref[...]).reshape(B, Nk, A)                              # (B, Nk, A)

    emb = emb_ref[...]                                                          # (3, A)
    emb_b = jnp.broadcast_to(emb[None, :, :], (B, 3, A))
    keys_cat = jnp.concatenate([emb_b, keys_p], axis=1)                         # (B, K, A)

    # ---- loop-invariant input-gate projections -------------------------------
    # prev = keys_cat[:, 1, :] = emb[1] at t == 0, and (PyTorch gscaler quirk)
    # prev = keys_cat[:, 0, :] = emb[0] for every t >= 1, independent of b.
    gih_both = (jnp.dot(emb[0:2, :], w_ih_ref[...],
                        preferred_element_type=jnp.float32) + b_ih_ref[...])    # (2, 3*GP)
    gih_t0 = gih_both[1:2, :]     # step 0      (prev = emb[1])
    gih_rest = gih_both[0:1, :]   # steps >= 1  (prev = emb[0])

    w_hh = w_hh_ref[...]
    b_hh = b_hh_ref[...]

    # T is small and static -> fully unrolled recurrence, state stays in vregs.
    for t in range(T):
        gih = gih_t0 if t == 0 else gih_rest

        # One fused (B, A) @ (A, 3*GP) matmul for all three hidden gates.
        ghh = jnp.dot(hx, w_hh, preferred_element_type=jnp.float32) + b_hh      # (B, 3*GP)

        r = jax.nn.sigmoid(gih[:, 0 * GP:0 * GP + A] + ghh[:, 0 * GP:0 * GP + A])
        z = jax.nn.sigmoid(gih[:, 1 * GP:1 * GP + A] + ghh[:, 1 * GP:1 * GP + A])
        n = jnp.tanh(gih[:, 2 * GP:2 * GP + A] + r * ghh[:, 2 * GP:2 * GP + A])
        hx = (1.0 - z) * n + z * hx                                             # (B, A)

        # attend(): batched contraction on the MXU (dec.unsqueeze(1) @ keys^T).
        s = jnp.einsum("bqd,bkd->bqk", hx[:, None, :], keys_cat,
                       preferred_element_type=jnp.float32)[:, 0, :]             # (B, K)
        mask_t = mask_ref[:, t, :]                                              # (B, K)
        s = jnp.where(mask_t > 0.0, NEG, s)
        m = jnp.max(s, axis=-1, keepdims=True)
        e = jnp.exp(s - m)
        a = e * pl.reciprocal(jnp.sum(e, axis=-1, keepdims=True), approx=False)

        out_ref[:, pl.ds(t, 1), :] = a[:, None, :]


# ---------------------------------------------------------------- wrapper ---
def _pack_gates(wT, b, gp=GATE_PAD):
    """(3, A, A), (3, 1, A) -> (A, 3*gp), (1, 3*gp), gate j at cols [j*gp, j*gp+A)."""
    n_gates, a_in, a_out = wT.shape
    w = jnp.zeros((a_in, n_gates * gp), jnp.float32)
    bb = jnp.zeros((1, n_gates * gp), jnp.float32)
    for j in range(n_gates):
        w = w.at[:, j * gp:j * gp + a_out].set(wT[j])
        bb = bb.at[:, j * gp:j * gp + a_out].set(b[j])
    return w, bb


def _whole_spec(shape):
    zeros = (0,) * len(shape)
    return pl.BlockSpec(shape, lambda *_: zeros)


def splanner_forward(params, hx, keys, mask, entlens, gold):
    B, Nk, hsz = keys.shape
    T = gold.shape[1]
    A = ASZ
    K = 3 + Nk

    # goldup and the per-step mask schedule are data-independent of the recurrence.
    goldup = jnp.where(gold < 3, 0, gold)
    goldup = goldup.at[jnp.arange(B), entlens].set(0).astype(jnp.int32)          # (B, T)

    mask0 = jnp.concatenate([jnp.zeros((B, 1, 3), mask.dtype), mask], axis=2)
    mask0 = mask0.reshape(B, K).astype(jnp.float32)                              # (B, K)

    onehot = (goldup[:, :, None] == jnp.arange(K)[None, None, :]).astype(jnp.float32)
    cum_prev = jnp.concatenate(
        [jnp.zeros((B, 1, K), jnp.float32), jnp.cumsum(onehot, axis=1)[:, :-1, :]],
        axis=1)
    # mask used by attend() at step t = mask0 OR one-hot(goldup[:, s]) for all s < t
    mask_all = jnp.maximum(mask0[:, None, :], (cum_prev > 0).astype(jnp.float32))  # (B, T, K)

    w_ih_p, b_ih_p = _pack_gates(params["w_ihT"], params["b_ih"])
    w_hh_p, b_hh_p = _pack_gates(params["w_hhT"], params["b_hh"])
    emb = params["emb"].reshape(3, A)

    inputs = (hx, keys, mask_all, emb,
              params["clin_wT"], params["clin_b"],
              params["klin_wT"], params["klin_b"],
              w_ih_p, b_ih_p, w_hh_p, b_hh_p)

    # TODO(synk): at production GraphWriter sizes (hsz~500, hundreds of entities), split the
    # klin projection into its own row-tiled pallas_call ("parallel" grid) so it fits v7x's
    # 64 MiB VMEM and shards across both TensorCores; the recurrence itself stays serial.
    out = pl.pallas_call(
        _splanner_kernel,
        out_shape=jax.ShapeDtypeStruct((B, T, K), jnp.float32),
        grid=(1,),
        in_specs=[_whole_spec(x.shape) for x in inputs],
        out_specs=_whole_spec((B, T, K)),
        compiler_params=pltpu.CompilerParams(dimension_semantics=("arbitrary",)),
    )(*inputs)
    return out                                                                    # (B, T, K)


# ---------------------------------------------------------- JAX reference ---
def reference_forward(params, hx, keys, mask, entlens, gold):
    B, Nk, hsz = keys.shape
    A = ASZ
    T = gold.shape[1]
    K = 3 + Nk
    hx = hx @ params["clin_wT"] + params["clin_b"]
    kp = (keys.reshape(B * Nk, hsz) @ params["klin_wT"] + params["klin_b"]).reshape(
        B, Nk, A
    )
    emb = jnp.broadcast_to(params["emb"], (B, 3, A))
    keysc = jnp.concatenate([emb, kp], axis=1)
    m = (
        jnp.concatenate([jnp.zeros((B, 1, 3), mask.dtype), mask], axis=2)
        .reshape(B, K)
        .astype(jnp.float32)
    )
    goldup = jnp.where(gold < 3, 0, gold)
    goldup = goldup.at[jnp.arange(B), entlens].set(0)
    prev = keysc[:, 1, :]
    ops = []
    for t in range(T):
        r = jax.nn.sigmoid(
            prev @ params["w_ihT"][0] + params["b_ih"][0]
            + hx @ params["w_hhT"][0] + params["b_hh"][0]
        )
        z = jax.nn.sigmoid(
            prev @ params["w_ihT"][1] + params["b_ih"][1]
            + hx @ params["w_hhT"][1] + params["b_hh"][1]
        )
        n = jnp.tanh(
            prev @ params["w_ihT"][2] + params["b_ih"][2]
            + r * (hx @ params["w_hhT"][2] + params["b_hh"][2])
        )
        hx = (1.0 - z) * n + z * hx
        s = jnp.einsum("bd,bkd->bk", hx, keysc)
        s = jnp.where(m > 0, -jnp.inf, s)
        a = jax.nn.softmax(s, axis=-1)
        ops.append(a[:, None, :])
        col = jnp.arange(K)[None, :]
        m = jnp.where(col == goldup[:, t : t + 1], 1.0, m)
        prev = keysc[:, 0, :]
    return jnp.concatenate(ops, axis=1)


# -------------------------------------------------------------------- main ---
def init_params(key, hsz):
    A = ASZ
    ks = jax.random.split(key, 10)
    # emb: xavier_normal_ on (1, 3, A): fan_in=3*A, fan_out=A -> std=sqrt(2/(4A))
    std_emb = float(np.sqrt(2.0 / (3 * A + A)))
    sc = 1.0 / float(np.sqrt(A))
    return {
        "emb": jax.random.normal(ks[0], (1, 3, A), jnp.float32) * std_emb,
        "clin_wT": jax.random.normal(ks[1], (hsz, A), jnp.float32) * (1.0 / np.sqrt(hsz)),
        "clin_b": jax.random.normal(ks[2], (1, A), jnp.float32) * 0.01,
        "klin_wT": jax.random.normal(ks[3], (hsz, A), jnp.float32) * (1.0 / np.sqrt(hsz)),
        "klin_b": jax.random.normal(ks[4], (1, A), jnp.float32) * 0.01,
        "w_ihT": jax.random.normal(ks[5], (3, A, A), jnp.float32) * sc,
        "w_hhT": jax.random.normal(ks[6], (3, A, A), jnp.float32) * sc,
        "b_ih": jax.random.normal(ks[7], (3, 1, A), jnp.float32) * sc,
        "b_hh": jax.random.normal(ks[8], (3, 1, A), jnp.float32) * sc,
    }


if __name__ == "__main__":
    B, hsz, Nk, T = 2, 32, 8, 5
    K = 3 + Nk

    key = jax.random.PRNGKey(0)
    k_hx, k_keys, k_mask, k_gold, k_par = jax.random.split(key, 5)

    hx = jax.random.normal(k_hx, (B, hsz), jnp.float32)
    keys = jax.random.normal(k_keys, (B, Nk, hsz), jnp.float32)
    mask = (jax.random.uniform(k_mask, (B, 1, Nk)) < 0.3).astype(jnp.int32)
    entlens = jnp.array([2, 3], dtype=jnp.int32)          # indices < T (see module)
    gold = jax.random.randint(k_gold, (B, T), 0, K, dtype=jnp.int32)

    params = init_params(k_par, hsz)

    out = jax.jit(splanner_forward)(params, hx, keys, mask, entlens, gold)
    out = jax.block_until_ready(out)

    ref = reference_forward(params, hx, keys, mask, entlens, gold)
    np.testing.assert_allclose(np.asarray(out), np.asarray(ref), rtol=1e-3, atol=1e-3)

    # TODO(synk): plan_decode() (greedy, data-dependent loop with exit()) and the
    # debug print()/cuda() calls have no Pallas equivalent and are not part of forward().
    print("KERNEL_OK")
</pallas_src>

<mosaic_0001>
module attributes {stable_mosaic.version = 11 : i64} {
  func.func @_splanner_kernel(%arg0: i32, %arg1: memref<2x32xf32, #tpu.memory_space<vmem>>, %arg2: memref<2x8x32xf32, #tpu.memory_space<vmem>>, %arg3: memref<2x5x11xf32, #tpu.memory_space<vmem>>, %arg4: memref<3x50xf32, #tpu.memory_space<vmem>>, %arg5: memref<32x50xf32, #tpu.memory_space<vmem>>, %arg6: memref<1x50xf32, #tpu.memory_space<vmem>>, %arg7: memref<32x50xf32, #tpu.memory_space<vmem>>, %arg8: memref<1x50xf32, #tpu.memory_space<vmem>>, %arg9: memref<50x384xf32, #tpu.memory_space<vmem>>, %arg10: memref<1x384xf32, #tpu.memory_space<vmem>>, %arg11: memref<50x384xf32, #tpu.memory_space<vmem>>, %arg12: memref<1x384xf32, #tpu.memory_space<vmem>>, %arg13: memref<2x5x11xf32, #tpu.memory_space<vmem>>) attributes {dimension_semantics = [#tpu.dimension_semantics<arbitrary>], iteration_bounds = array<i64: 1>, scalar_prefetch = 0 : i64, scratch_operands = 0 : i64, tpu.core_type = #tpu.core_type<tc>, window_params = [{pipeline_mode = #tpu.pipeline_mode<synchronous>, transform_indices = @transform_0, window_bounds = array<i64: 2, 32>}, {pipeline_mode = #tpu.pipeline_mode<synchronous>, transform_indices = @transform_1, window_bounds = array<i64: 2, 8, 32>}, {pipeline_mode = #tpu.pipeline_mode<synchronous>, transform_indices = @transform_2, window_bounds = array<i64: 2, 5, 11>}, {pipeline_mode = #tpu.pipeline_mode<synchronous>, transform_indices = @transform_3, window_bounds = array<i64: 3, 50>}, {pipeline_mode = #tpu.pipeline_mode<synchronous>, transform_indices = @transform_4, window_bounds = array<i64: 32, 50>}, {pipeline_mode = #tpu.pipeline_mode<synchronous>, transform_indices = @transform_5, window_bounds = array<i64: 1, 50>}, {pipeline_mode = #tpu.pipeline_mode<synchronous>, transform_indices = @transform_6, window_bounds = array<i64: 32, 50>}, {pipeline_mode = #tpu.pipeline_mode<synchronous>, transform_indices = @transform_7, window_bounds = array<i64: 1, 50>}, {pipeline_mode = #tpu.pipeline_mode<synchronous>, transform_indices = @transform_8, window_bounds = array<i64: 50, 384>}, {pipeline_mode = #tpu.pipeline_mode<synchronous>, transform_indices = @transform_9, window_bounds = array<i64: 1, 384>}, {pipeline_mode = #tpu.pipeline_mode<synchronous>, transform_indices = @transform_10, window_bounds = array<i64: 50, 384>}, {pipeline_mode = #tpu.pipeline_mode<synchronous>, transform_indices = @transform_11, window_bounds = array<i64: 1, 384>}, {pipeline_mode = #tpu.pipeline_mode<synchronous>, transform_indices = @transform_12, window_bounds = array<i64: 2, 5, 11>}]} {
    %c0 = arith.constant 0 : index
    %c0_0 = arith.constant 0 : index
    %0 = vector.load %arg1[%c0, %c0_0] : memref<2x32xf32, #tpu.memory_space<vmem>>, vector<2x32xf32>
    %c0_1 = arith.constant 0 : index
    %c0_2 = arith.constant 0 : index
    %1 = vector.load %arg5[%c0_1, %c0_2] : memref<32x50xf32, #tpu.memory_space<vmem>>, vector<32x50xf32>
    %cst = arith.constant dense<0.000000e+00> : vector<2x50xf32>
    %2 = tpu.matmul %0, %1, %cst {dimension_numbers = #tpu.dot_dimension_numbers<[1], [0], [0], [1], [0, 0, 1, 1], [], []>} : vector<2x32xf32>, vector<32x50xf32>, vector<2x50xf32> -> vector<2x50xf32>
    %c0_3 = arith.constant 0 : index
    %c0_4 = arith.constant 0 : index
    %3 = vector.load %arg6[%c0_3, %c0_4] : memref<1x50xf32, #tpu.memory_space<vmem>>, vector<1x50xf32>
    %4 = vector.broadcast %3 : vector<1x50xf32> to vector<2x50xf32>
    %5 = arith.addf %2, %4 : vector<2x50xf32>
    %c0_5 = arith.constant 0 : index
    %c0_6 = arith.constant 0 : index
    %c0_7 = arith.constant 0 : index
    %6 = vector.load %arg2[%c0_5, %c0_6, %c0_7] : memref<2x8x32xf32, #tpu.memory_space<vmem>>, vector<2x8x32xf32>
    %7 = vector.shape_cast %6 : vector<2x8x32xf32> to vector<16x32xf32>
    %c0_8 = arith.constant 0 : index
    %c0_9 = arith.constant 0 : index
    %8 = vector.load %arg7[%c0_8, %c0_9] : memref<32x50xf32, #tpu.memory_space<vmem>>, vector<32x50xf32>
    %cst_10 = arith.constant dense<0.000000e+00> : vector<16x50xf32>
    %9 = tpu.matmul %7, %8, %cst_10 {dimension_numbers = #tpu.dot_dimension_numbers<[1], [0], [0], [1], [0, 0, 1, 1], [], []>} : vector<16x32xf32>, vector<32x50xf32>, vector<16x50xf32> -> vector<16x50xf32>
    %c0_11 = arith.constant 0 : index
    %c0_12 = arith.constant 0 : index
    %10 = vector.load %arg8[%c0_11, %c0_12] : memref<1x50xf32, #tpu.memory_space<vmem>>, vector<1x50xf32>
    %11 = vector.broadcast %10 : vector<1x50xf32> to vector<16x50xf32>
    %12 = arith.addf %9, %11 : vector<16x50xf32>
    %13 = vector.shape_cast %12 : vector<16x50xf32> to vector<2x8x50xf32>
    %c0_13 = arith.constant 0 : index
    %c0_14 = arith.constant 0 : index
    %14 = vector.load %arg4[%c0_13, %c0_14] : memref<3x50xf32, #tpu.memory_space<vmem>>, vector<3x50xf32>
    %15 = vector.shape_cast %14 : vector<3x50xf32> to vector<1x3x50xf32>
    %16 = vector.shape_cast %15 : vector<1x3x50xf32> to vector<1x3x50xf32>
    %17 = vector.broadcast %16 : vector<1x3x50xf32> to vector<2x3x50xf32>
    %18 = tpu.concatenate %17, %13 in 1 : vector<2x3x50xf32>, vector<2x8x50xf32> -> vector<2x11x50xf32>
    %19 = vector.extract_strided_slice %14 {offsets = [0, 0], sizes = [2, 50], strides = [1, 1]} : vector<3x50xf32> to vector<2x50xf32>
    %c0_15 = arith.constant 0 : index
    %c0_16 = arith.constant 0 : index
    %20 = vector.load %arg9[%c0_15, %c0_16] : memref<50x384xf32, #tpu.memory_space<vmem>>, vector<50x384xf32>
    %cst_17 = arith.constant dense<0.000000e+00> : vector<2x384xf32>
    %21 = tpu.matmul %19, %20, %cst_17 {dimension_numbers = #tpu.dot_dimension_numbers<[1], [0], [0], [1], [0, 0, 1, 1], [], []>} : vector<2x50xf32>, vector<50x384xf32>, vector<2x384xf32> -> vector<2x384xf32>
    %c0_18 = arith.constant 0 : index
    %c0_19 = arith.constant 0 : index
    %22 = vector.load %arg10[%c0_18, %c0_19] : memref<1x384xf32, #tpu.memory_space<vmem>>, vector<1x384xf32>
    %23 = vector.broadcast %22 : vector<1x384xf32> to vector<2x384xf32>
    %24 = arith.addf %21, %23 : vector<2x384xf32>
    %25 = vector.extract_strided_slice %24 {offsets = [1, 0], sizes = [1, 384], strides = [1, 1]} : vector<2x384xf32> to vector<1x384xf32>
    %26 = vector.extract_strided_slice %24 {offsets = [0, 0], sizes = [1, 384], strides = [1, 1]} : vector<2x384xf32> to vector<1x384xf32>
    %c0_20 = arith.constant 0 : index
    %c0_21 = arith.constant 0 : index
    %27 = vector.load %arg11[%c0_20, %c0_21] : memref<50x384xf32, #tpu.memory_space<vmem>>, vector<50x384xf32>
    %c0_22 = arith.constant 0 : index
    %c0_23 = arith.constant 0 : index
    %28 = vector.load %arg12[%c0_22, %c0_23] : memref<1x384xf32, #tpu.memory_space<vmem>>, vector<1x384xf32>
    %cst_24 = arith.constant dense<0.000000e+00> : vector<2x384xf32>
    %29 = tpu.matmul %5, %27, %cst_24 {dimension_numbers = #tpu.dot_dimension_numbers<[1], [0], [0], [1], [0, 0, 1, 1], [], []>} : vector<2x50xf32>, vector<50x384xf32>, vector<2x384xf32> -> vector<2x384xf32>
    %30 = vector.broadcast %28 : vector<1x384xf32> to vector<2x384xf32>
    %31 = arith.addf %29, %30 : vector<2x384xf32>
    %32 = vector.extract_strided_slice %25 {offsets = [0, 0], sizes = [1, 50], strides = [1, 1]} : vector<1x384xf32> to vector<1x50xf32>
    %33 = vector.extract_strided_slice %31 {offsets = [0, 0], sizes = [2, 50], strides = [1, 1]} : vector<2x384xf32> to vector<2x50xf32>
    %34 = vector.broadcast %32 : vector<1x50xf32> to vector<2x50xf32>
    %35 = arith.addf %34, %33 : vector<2x50xf32>
    %36 = arith.negf %35 : vector<2x50xf32>
    %37 = math.exp %36 : vector<2x50xf32>
    %cst_25 = arith.constant 1.000000e+00 : f32
    %38 = vector.broadcast %cst_25 : f32 to vector<2x50xf32>
    %39 = arith.addf %38, %37 : vector<2x50xf32>
    %40 = arith.divf %38, %39 : vector<2x50xf32>
    %41 = vector.extract_strided_slice %25 {offsets = [0, 128], sizes = [1, 50], strides = [1, 1]} : vector<1x384xf32> to vector<1x50xf32>
    %42 = vector.extract_strided_slice %31 {offsets = [0, 128], sizes = [2, 50], strides = [1, 1]} : vector<2x384xf32> to vector<2x50xf32>
    %43 = vector.broadcast %41 : vector<1x50xf32> to vector<2x50xf32>
    %44 = arith.addf %43, %42 : vector<2x50xf32>
    %45 = arith.negf %44 : vector<2x50xf32>
    %46 = math.exp %45 : vector<2x50xf32>
    %cst_26 = arith.constant 1.000000e+00 : f32
    %47 = vector.broadcast %cst_26 : f32 to vector<2x50xf32>
    %48 = arith.addf %47, %46 : vector<2x50xf32>
    %49 = arith.divf %47, %48 : vector<2x50xf32>
    %50 = vector.extract_strided_slice %25 {offsets = [0, 256], sizes = [1, 50], strides = [1, 1]} : vector<1x384xf32> to vector<1x50xf32>
    %51 = vector.extract_strided_slice %31 {offsets = [0, 256], sizes = [2, 50], strides = [1, 1]} : vector<2x384xf32> to vector<2x50xf32>
    %52 = arith.mulf %40, %51 : vector<2x50xf32>
    %53 = vector.broadcast %50 : vector<1x50xf32> to vector<2x50xf32>
    %54 = arith.addf %53, %52 : vector<2x50xf32>
    %55 = math.tanh %54 : vector<2x50xf32>
    %cst_27 = arith.constant 1.000000e+00 : f32
    %56 = vector.broadcast %cst_27 : f32 to vector<2x50xf32>
    %57 = arith.subf %56, %49 : vector<2x50xf32>
    %58 = arith.mulf %57, %55 : vector<2x50xf32>
    %59 = arith.mulf %49, %5 : vector<2x50xf32>
    %60 = arith.addf %58, %59 : vector<2x50xf32>
    %61 = vector.shape_cast %60 : vector<2x50xf32> to vector<2x1x50xf32>
    "tpu.trace_start"() <{level = 10 : i32, message = "bqd,bkd->bqk"}> : () -> ()
    %cst_28 = arith.constant dense<0.000000e+00> : vector<2x1x11xf32>
    %62 = tpu.matmul %61, %18, %cst_28 {dimension_numbers = #tpu.dot_dimension_numbers<[2], [2], [1], [1], [0, 0, 0, 1, 1, 1], [0], [0]>} : vector<2x1x50xf32>, vector<2x11x50xf32>, vector<2x1x11xf32> -> vector<2x1x11xf32>
    "tpu.trace_stop"() : () -> ()
    %63 = vector.shape_cast %62 : vector<2x1x11xf32> to vector<2x11xf32>
    %c0_29 = arith.constant 0 : index
    %c0_30 = arith.constant 0 : index
    %c0_31 = arith.constant 0 : index
    %64 = vector.load %arg3[%c0_29, %c0_30, %c0_31] : memref<2x5x11xf32, #tpu.memory_space<vmem>>, vector<2x1x11xf32>
    %65 = vector.shape_cast %64 : vector<2x1x11xf32> to vector<2x11xf32>
    %cst_32 = arith.constant 0.000000e+00 : f32
    %66 = vector.broadcast %cst_32 : f32 to vector<2x11xf32>
    %67 = arith.cmpf ogt, %65, %66 : vector<2x11xf32>
    %cst_33 = arith.constant -1.000000e+30 : f32
    %68 = vector.broadcast %cst_33 : f32 to vector<2x11xf32>
    %69 = arith.select %67, %68, %63 : vector<2x11xi1>, vector<2x11xf32>
    %cst_34 = arith.constant dense<0xFF800000> : vector<2xf32>
    %70 = vector.multi_reduction <maximumf>, %69, %cst_34 [1] : vector<2x11xf32> to vector<2xf32>
    %71 = vector.shape_cast %70 : vector<2xf32> to vector<2x1xf32>
    %72 = vector.broadcast %71 : vector<2x1xf32> to vector<2x11xf32>
    %73 = arith.subf %69, %72 : vector<2x11xf32>
    %74 = math.exp %73 : vector<2x11xf32>
    %cst_35 = arith.constant dense<0.000000e+00> : vector<2xf32>
    %75 = vector.multi_reduction <add>, %74, %cst_35 [1] : vector<2x11xf32> to vector<2xf32>
    %76 = vector.shape_cast %75 : vector<2xf32> to vector<2x1xf32>
    %77 = tpu.reciprocal %76 : vector<2x1xf32> -> vector<2x1xf32>
    %78 = vector.broadcast %77 : vector<2x1xf32> to vector<2x11xf32>
    %79 = arith.mulf %74, %78 : vector<2x11xf32>
    %80 = vector.shape_cast %79 : vector<2x11xf32> to vector<2x1x11xf32>
    %c0_36 = arith.constant 0 : index
    %c0_37 = arith.constant 0 : index
    %c0_38 = arith.constant 0 : index
    %81 = vector.load %arg13[%c0_36, %c0_37, %c0_38] : memref<2x5x11xf32, #tpu.memory_space<vmem>>, vector<2x1x11xf32>
    tpu.vector_store %arg13[%c0_36, %c0_37, %c0_38], %80 {strides = array<i32>} : memref<2x5x11xf32, #tpu.memory_space<vmem>>, vector<2x1x11xf32>,
    %cst_39 = arith.constant dense<0.000000e+00> : vector<2x384xf32>
    %82 = tpu.matmul %60, %27, %cst_39 {dimension_numbers = #tpu.dot_dimension_numbers<[1], [0], [0], [1], [0, 0, 1, 1], [], []>} : vector<2x50xf32>, vector<50x384xf32>, vector<2x384xf32> -> vector<2x384xf32>
    %83 = vector.broadcast %28 : vector<1x384xf32> to vector<2x384xf32>
    %84 = arith.addf %82, %83 : vector<2x384xf32>
    %85 = vector.extract_strided_slice %26 {offsets = [0, 0], sizes = [1, 50], strides = [1, 1]} : vector<1x384xf32> to vector<1x50xf32>
    %86 = vector.extract_strided_slice %84 {offsets = [0, 0], sizes = [2, 50], strides = [1, 1]} : vector<2x384xf32> to vector<2x50xf32>
    %87 = vector.broadcast %85 : vector<1x50xf32> to vector<2x50xf32>
    %88 = arith.addf %87, %86 : vector<2x50xf32>
    %89 = arith.negf %88 : vector<2x50xf32>
    %90 = math.exp %89 : vector<2x50xf32>
    %cst_40 = arith.constant 1.000000e+00 : f32
    %91 = vector.broadcast %cst_40 : f32 to vector<2x50xf32>
    %92 = arith.addf %91, %90 : vector<2x50xf32>
    %93 = arith.divf %91, %92 : vector<2x50xf32>
    %94 = vector.extract_strided_slice %26 {offsets = [0, 128], sizes = [1, 50], strides = [1, 1]} : vector<1x384xf32> to vector<1x50xf32>
    %95 = vector.extract_strided_slice %84 {offsets = [0, 128], sizes = [2, 50], strides = [1, 1]} : vector<2x384xf32> to vector<2x50xf32>
    %96 = vector.broadcast %94 : vector<1x50xf32> to vector<2x50xf32>
    %97 = arith.addf %96, %95 : vector<2x50xf32>
    %98 = arith.negf %97 : vector<2x50xf32>
    %99 = math.exp %98 : vector<2x50xf32>
    %cst_41 = arith.constant 1.000000e+00 : f32
    %100 = vector.broadcast %cst_41 : f32 to vector<2x50xf32>
    %101 = arith.addf %100, %99 : vector<2x50xf32>
    %102 = arith.divf %100, %101 : vector<2x50xf32>
    %103 = vector.extract_strided_slice %26 {offsets = [0, 256], sizes = [1, 50], strides = [1, 1]} : vector<1x384xf32> to vector<1x50xf32>
    %104 = vector.extract_strided_slice %84 {offsets = [0, 256], sizes = [2, 50], strides = [1, 1]} : vector<2x384xf32> to vector<2x50xf32>
    %105 = arith.mulf %93, %104 : vector<2x50xf32>
    %106 = vector.broadcast %103 : vector<1x50xf32> to vector<2x50xf32>
    %107 = arith.addf %106, %105 : vector<2x50xf32>
    %108 = math.tanh %107 : vector<2x50xf32>
    %cst_42 = arith.constant 1.000000e+00 : f32
    %109 = vector.broadcast %cst_42 : f32 to vector<2x50xf32>
    %110 = arith.subf %109, %102 : vector<2x50xf32>
    %111 = arith.mulf %110, %108 : vector<2x50xf32>
    %112 = arith.mulf %102, %60 : vector<2x50xf32>
    %113 = arith.addf %111, %112 : vector<2x50xf32>
    %114 = vector.shape_cast %113 : vector<2x50xf32> to vector<2x1x50xf32>
    "tpu.trace_start"() <{level = 10 : i32, message = "bqd,bkd->bqk"}> : () -> ()
    %cst_43 = arith.constant dense<0.000000e+00> : vector<2x1x11xf32>
    %115 = tpu.matmul %114, %18, %cst_43 {dimension_numbers = #tpu.dot_dimension_numbers<[2], [2], [1], [1], [0, 0, 0, 1, 1, 1], [0], [0]>} : vector<2x1x50xf32>, vector<2x11x50xf32>, vector<2x1x11xf32> -> vector<2x1x11xf32>
    "tpu.trace_stop"() : () -> ()
    %116 = vector.shape_cast %115 : vector<2x1x11xf32> to vector<2x11xf32>
    %c0_44 = arith.constant 0 : index
    %c1 = arith.constant 1 : index
    %c0_45 = arith.constant 0 : index
    %117 = vector.load %arg3[%c0_44, %c1, %c0_45] : memref<2x5x11xf32, #tpu.memory_space<vmem>>, vector<2x1x11xf32>
    %118 = vector.shape_cast %117 : vector<2x1x11xf32> to vector<2x11xf32>
    %cst_46 = arith.constant 0.000000e+00 : f32
    %119 = vector.broadcast %cst_46 : f32 to vector<2x11xf32>
    %120 = arith.cmpf ogt, %118, %119 : vector<2x11xf32>
    %cst_47 = arith.constant -1.000000e+30 : f32
    %121 = vector.broadcast %cst_47 : f32 to vector<2x11xf32>
    %122 = arith.select %120, %121, %116 : vector<2x11xi1>, vector<2x11xf32>
    %cst_48 = arith.constant dense<0xFF800000> : vector<2xf32>
    %123 = vector.multi_reduction <maximumf>, %122, %cst_48 [1] : vector<2x11xf32> to vector<2xf32>
    %124 = vector.shape_cast %123 : vector<2xf32> to vector<2x1xf32>
    %125 = vector.broadcast %124 : vector<2x1xf32> to vector<2x11xf32>
    %126 = arith.subf %122, %125 : vector<2x11xf32>
    %127 = math.exp %126 : vector<2x11xf32>
    %cst_49 = arith.constant dense<0.000000e+00> : vector<2xf32>
    %128 = vector.multi_reduction <add>, %127, %cst_49 [1] : vector<2x11xf32> to vector<2xf32>
    %129 = vector.shape_cast %128 : vector<2xf32> to vector<2x1xf32>
    %130 = tpu.reciprocal %129 : vector<2x1xf32> -> vector<2x1xf32>
    %131 = vector.broadcast %130 : vector<2x1xf32> to vector<2x11xf32>
    %132 = arith.mulf %127, %131 : vector<2x11xf32>
    %133 = vector.shape_cast %132 : vector<2x11xf32> to vector<2x1x11xf32>
    %c0_50 = arith.constant 0 : index
    %c1_51 = arith.constant 1 : index
    %c0_52 = arith.constant 0 : index
    %134 = vector.load %arg13[%c0_50, %c1_51, %c0_52] : memref<2x5x11xf32, #tpu.memory_space<vmem>>, vector<2x1x11xf32>
    tpu.vector_store %arg13[%c0_50, %c1_51, %c0_52], %133 {strides = array<i32>} : memref<2x5x11xf32, #tpu.memory_space<vmem>>, vector<2x1x11xf32>,
    %cst_53 = arith.constant dense<0.000000e+00> : vector<2x384xf32>
    %135 = tpu.matmul %113, %27, %cst_53 {dimension_numbers = #tpu.dot_dimension_numbers<[1], [0], [0], [1], [0, 0, 1, 1], [], []>} : vector<2x50xf32>, vector<50x384xf32>, vector<2x384xf32> -> vector<2x384xf32>
    %136 = vector.broadcast %28 : vector<1x384xf32> to vector<2x384xf32>
    %137 = arith.addf %135, %136 : vector<2x384xf32>
    %138 = vector.extract_strided_slice %26 {offsets = [0, 0], sizes = [1, 50], strides = [1, 1]} : vector<1x384xf32> to vector<1x50xf32>
    %139 = vector.extract_strided_slice %137 {offsets = [0, 0], sizes = [2, 50], strides = [1, 1]} : vector<2x384xf32> to vector<2x50xf32>
    %140 = vector.broadcast %138 : vector<1x50xf32> to vector<2x50xf32>
    %141 = arith.addf %140, %139 : vector<2x50xf32>
    %142 = arith.negf %141 : vector<2x50xf32>
    %143 = math.exp %142 : vector<2x50xf32>
    %cst_54 = arith.constant 1.000000e+00 : f32
    %144 = vector.broadcast %cst_54 : f32 to vector<2x50xf32>
    %145 = arith.addf %144, %143 : vector<2x50xf32>
    %146 = arith.divf %144, %145 : vector<2x50xf32>
    %147 = vector.extract_strided_slice %26 {offsets = [0, 128], sizes = [1, 50], strides = [1, 1]} : vector<1x384xf32> to vector<1x50xf32>
    %148 = vector.extract_strided_slice %137 {offsets = [0, 128], sizes = [2, 50], strides = [1, 1]} : vector<2x384xf32> to vector<2x50xf32>
    %149 = vector.broadcast %147 : vector<1x50xf32> to vector<2x50xf32>
    %150 = arith.addf %149, %148 : vector<2x50xf32>
    %151 = arith.negf %150 : vector<2x50xf32>
    %152 = math.exp %151 : vector<2x50xf32>
    %cst_55 = arith.constant 1.000000e+00 : f32
    %153 = vector.broadcast %cst_55 : f32 to vector<2x50xf32>
    %154 = arith.addf %153, %152 : vector<2x50xf32>
    %155 = arith.divf %153, %154 : vector<2x50xf32>
    %156 = vector.extract_strided_slice %26 {offsets = [0, 256], sizes = [1, 50], strides = [1, 1]} : vector<1x384xf32> to vector<1x50xf32>
    %157 = vector.extract_strided_slice %137 {offsets = [0, 256], sizes = [2, 50], strides = [1, 1]} : vector<2x384xf32> to vector<2x50xf32>
    %158 = arith.mulf %146, %157 : vector<2x50xf32>
    %159 = vector.broadcast %156 : vector<1x50xf32> to vector<2x50xf32>
    %160 = arith.addf %159, %158 : vector<2x50xf32>
    %161 = math.tanh %160 : vector<2x50xf32>
    %cst_56 = arith.constant 1.000000e+00 : f32
    %162 = vector.broadcast %cst_56 : f32 to vector<2x50xf32>
    %163 = arith.subf %162, %155 : vector<2x50xf32>
    %164 = arith.mulf %163, %161 : vector<2x50xf32>
    %165 = arith.mulf %155, %113 : vector<2x50xf32>
    %166 = arith.addf %164, %165 : vector<2x50xf32>
    %167 = vector.shape_cast %166 : vector<2x50xf32> to vector<2x1x50xf32>
    "tpu.trace_start"() <{level = 10 : i32, message = "bqd,bkd->bqk"}> : () -> ()
    %cst_57 = arith.constant dense<0.000000e+00> : vector<2x1x11xf32>
    %168 = tpu.matmul %167, %18, %cst_57 {dimension_numbers = #tpu.dot_dimension_numbers<[2], [2], [1], [1], [0, 0, 0, 1, 1, 1], [0], [0]>} : vector<2x1x50xf32>, vector<2x11x50xf32>, vector<2x1x11xf32> -> vector<2x1x11xf32>
    "tpu.trace_stop"() : () -> ()
    %169 = vector.shape_cast %168 : vector<2x1x11xf32> to vector<2x11xf32>
    %c0_58 = arith.constant 0 : index
    %c2 = arith.constant 2 : index
    %c0_59 = arith.constant 0 : index
    %170 = vector.load %arg3[%c0_58, %c2, %c0_59] : memref<2x5x11xf32, #tpu.memory_space<vmem>>, vector<2x1x11xf32>
    %171 = vector.shape_cast %170 : vector<2x1x11xf32> to vector<2x11xf32>
    %cst_60 = arith.constant 0.000000e+00 : f32
    %172 = vector.broadcast %cst_60 : f32 to vector<2x11xf32>
    %173 = arith.cmpf ogt, %171, %172 : vector<2x11xf32>
    %cst_61 = arith.constant -1.000000e+30 : f32
    %174 = vector.broadcast %cst_61 : f32 to vector<2x11xf32>
    %175 = arith.select %173, %174, %169 : vector<2x11xi1>, vector<2x11xf32>
    %cst_62 = arith.constant dense<0xFF800000> : vector<2xf32>
    %176 = vector.multi_reduction <maximumf>, %175, %cst_62 [1] : vector<2x11xf32> to vector<2xf32>
    %177 = vector.shape_cast %176 : vector<2xf32> to vector<2x1xf32>
    %178 = vector.broadcast %177 : vector<2x1xf32> to vector<2x11xf32>
    %179 = arith.subf %175, %178 : vector<2x11xf32>
    %180 = math.exp %179 : vector<2x11xf32>
    %cst_63 = arith.constant dense<0.000000e+00> : vector<2xf32>
    %181 = vector.multi_reduction <add>, %180, %cst_63 [1] : vector<2x11xf32> to vector<2xf32>
    %182 = vector.shape_cast %181 : vector<2xf32> to vector<2x1xf32>
    %183 = tpu.reciprocal %182 : vector<2x1xf32> -> vector<2x1xf32>
    %184 = vector.broadcast %183 : vector<2x1xf32> to vector<2x11xf32>
    %185 = arith.mulf %180, %184 : vector<2x11xf32>
    %186 = vector.shape_cast %185 : vector<2x11xf32> to vector<2x1x11xf32>
    %c0_64 = arith.constant 0 : index
    %c2_65 = arith.constant 2 : index
    %c0_66 = arith.constant 0 : index
    %187 = vector.load %arg13[%c0_64, %c2_65, %c0_66] : memref<2x5x11xf32, #tpu.memory_space<vmem>>, vector<2x1x11xf32>
    tpu.vector_store %arg13[%c0_64, %c2_65, %c0_66], %186 {strides = array<i32>} : memref<2x5x11xf32, #tpu.memory_space<vmem>>, vector<2x1x11xf32>,
    %cst_67 = arith.constant dense<0.000000e+00> : vector<2x384xf32>
    %188 = tpu.matmul %166, %27, %cst_67 {dimension_numbers = #tpu.dot_dimension_numbers<[1], [0], [0], [1], [0, 0, 1, 1], [], []>} : vector<2x50xf32>, vector<50x384xf32>, vector<2x384xf32> -> vector<2x384xf32>
    %189 = vector.broadcast %28 : vector<1x384xf32> to vector<2x384xf32>
    %190 = arith.addf %188, %189 : vector<2x384xf32>
    %191 = vector.extract_strided_slice %26 {offsets = [0, 0], sizes = [1, 50], strides = [1, 1]} : vector<1x384xf32> to vector<1x50xf32>
    %192 = vector.extract_strided_slice %190 {offsets = [0, 0], sizes = [2, 50], strides = [1, 1]} : vector<2x384xf32> to vector<2x50xf32>
    %193 = vector.broadcast %191 : vector<1x50xf32> to vector<2x50xf32>
    %194 = arith.addf %193, %192 : vector<2x50xf32>
    %195 = arith.negf %194 : vector<2x50xf32>
    %196 = math.exp %195 : vector<2x50xf32>
    %cst_68 = arith.constant 1.000000e+00 : f32
    %197 = vector.broadcast %cst_68 : f32 to vector<2x50xf32>
    %198 = arith.addf %197, %196 : vector<2x50xf32>
    %199 = arith.divf %197, %198 : vector<2x50xf32>
    %200 = vector.extract_strided_slice %26 {offsets = [0, 128], sizes = [1, 50], strides = [1, 1]} : vector<1x384xf32> to vector<1x50xf32>
    %201 = vector.extract_strided_slice %190 {offsets = [0, 128], sizes = [2, 50], strides = [1, 1]} : vector<2x384xf32> to vector<2x50xf32>
    %202 = vector.broadcast %200 : vector<1x50xf32> to vector<2x50xf32>
    %203 = arith.addf %202, %201 : vector<2x50xf32>
    %204 = arith.negf %203 : vector<2x50xf32>
    %205 = math.exp %204 : vector<2x50xf32>
    %cst_69 = arith.constant 1.000000e+00 : f32
    %206 = vector.broadcast %cst_69 : f32 to vector<2x50xf32>
    %207 = arith.addf %206, %205 : vector<2x50xf32>
    %208 = arith.divf %206, %207 : vector<2x50xf32>
    %209 = vector.extract_strided_slice %26 {offsets = [0, 256], sizes = [1, 50], strides = [1, 1]} : vector<1x384xf32> to vector<1x50xf32>
    %210 = vector.extract_strided_slice %190 {offsets = [0, 256], sizes = [2, 50], strides = [1, 1]} : vector<2x384xf32> to vector<2x50xf32>
    %211 = arith.mulf %199, %210 : vector<2x50xf32>
    %212 = vector.broadcast %209 : vector<1x50xf32> to vector<2x50xf32>
    %213 = arith.addf %212, %211 : vector<2x50xf32>
    %214 = math.tanh %213 : vector<2x50xf32>
    %cst_70 = arith.constant 1.000000e+00 : f32
    %215 = vector.broadcast %cst_70 : f32 to vector<2x50xf32>
    %216 = arith.subf %215, %208 : vector<2x50xf32>
    %217 = arith.mulf %216, %214 : vector<2x50xf32>
    %218 = arith.mulf %208, %166 : vector<2x50xf32>
    %219 = arith.addf %217, %218 : vector<2x50xf32>
    %220 = vector.shape_cast %219 : vector<2x50xf32> to vector<2x1x50xf32>
    "tpu.trace_start"() <{level = 10 : i32, message = "bqd,bkd->bqk"}> : () -> ()
    %cst_71 = arith.constant dense<0.000000e+00> : vector<2x1x11xf32>
    %221 = tpu.matmul %220, %18, %cst_71 {dimension_numbers = #tpu.dot_dimension_numbers<[2], [2], [1], [1], [0, 0, 0, 1, 1, 1], [0], [0]>} : vector<2x1x50xf32>, vector<2x11x50xf32>, vector<2x1x11xf32> -> vector<2x1x11xf32>
    "tpu.trace_stop"() : () -> ()
    %222 = vector.shape_cast %221 : vector<2x1x11xf32> to vector<2x11xf32>
    %c0_72 = arith.constant 0 : index
    %c3 = arith.constant 3 : index
    %c0_73 = arith.constant 0 : index
    %223 = vector.load %arg3[%c0_72, %c3, %c0_73] : memref<2x5x11xf32, #tpu.memory_space<vmem>>, vector<2x1x11xf32>
    %224 = vector.shape_cast %223 : vector<2x1x11xf32> to vector<2x11xf32>
    %cst_74 = arith.constant 0.000000e+00 : f32
    %225 = vector.broadcast %cst_74 : f32 to vector<2x11xf32>
    %226 = arith.cmpf ogt, %224, %225 : vector<2x11xf32>
    %cst_75 = arith.constant -1.000000e+30 : f32
    %227 = vector.broadcast %cst_75 : f32 to vector<2x11xf32>
    %228 = arith.select %226, %227, %222 : vector<2x11xi1>, vector<2x11xf32>
    %cst_76 = arith.constant dense<0xFF800000> : vector<2xf32>
    %229 = vector.multi_reduction <maximumf>, %228, %cst_76 [1] : vector<2x11xf32> to vector<2xf32>
    %230 = vector.shape_cast %229 : vector<2xf32> to vector<2x1xf32>
    %231 = vector.broadcast %230 : vector<2x1xf32> to vector<2x11xf32>
    %232 = arith.subf %228, %231 : vector<2x11xf32>
    %233 = math.exp %232 : vector<2x11xf32>
    %cst_77 = arith.constant dense<0.000000e+00> : vector<2xf32>
    %234 = vector.multi_reduction <add>, %233, %cst_77 [1] : vector<2x11xf32> to vector<2xf32>
    %235 = vector.shape_cast %234 : vector<2xf32> to vector<2x1xf32>
    %236 = tpu.reciprocal %235 : vector<2x1xf32> -> vector<2x1xf32>
    %237 = vector.broadcast %236 : vector<2x1xf32> to vector<2x11xf32>
    %238 = arith.mulf %233, %237 : vector<2x11xf32>
    %239 = vector.shape_cast %238 : vector<2x11xf32> to vector<2x1x11xf32>
    %c0_78 = arith.constant 0 : index
    %c3_79 = arith.constant 3 : index
    %c0_80 = arith.constant 0 : index
    %240 = vector.load %arg13[%c0_78, %c3_79, %c0_80] : memref<2x5x11xf32, #tpu.memory_space<vmem>>, vector<2x1x11xf32>
    tpu.vector_store %arg13[%c0_78, %c3_79, %c0_80], %239 {strides = array<i32>} : memref<2x5x11xf32, #tpu.memory_space<vmem>>, vector<2x1x11xf32>,
    %cst_81 = arith.constant dense<0.000000e+00> : vector<2x384xf32>
    %241 = tpu.matmul %219, %27, %cst_81 {dimension_numbers = #tpu.dot_dimension_numbers<[1], [0], [0], [1], [0, 0, 1, 1], [], []>} : vector<2x50xf32>, vector<50x384xf32>, vector<2x384xf32> -> vector<2x384xf32>
    %242 = vector.broadcast %28 : vector<1x384xf32> to vector<2x384xf32>
    %243 = arith.addf %241, %242 : vector<2x384xf32>
    %244 = vector.extract_strided_slice %26 {offsets = [0, 0], sizes = [1, 50], strides = [1, 1]} : vector<1x384xf32> to vector<1x50xf32>
    %245 = vector.extract_strided_slice %243 {offsets = [0, 0], sizes = [2, 50], strides = [1, 1]} : vector<2x384xf32> to vector<2x50xf32>
    %246 = vector.broadcast %244 : vector<1x50xf32> to vector<2x50xf32>
    %247 = arith.addf %246, %245 : vector<2x50xf32>
    %248 = arith.negf %247 : vector<2x50xf32>
    %249 = math.exp %248 : vector<2x50xf32>
    %cst_82 = arith.constant 1.000000e+00 : f32
    %250 = vector.broadcast %cst_82 : f32 to vector<2x50xf32>
    %251 = arith.addf %250, %249 : vector<2x50xf32>
    %252 = arith.divf %250, %251 : vector<2x50xf32>
    %253 = vector.extract_strided_slice %26 {offsets = [0, 128], sizes = [1, 50], strides = [1, 1]} : vector<1x384xf32> to vector<1x50xf32>
    %254 = vector.extract_strided_slice %243 {offsets = [0, 128], sizes = [2, 50], strides = [1, 1]} : vector<2x384xf32> to vector<2x50xf32>
    %255 = vector.broadcast %253 : vector<1x50xf32> to vector<2x50xf32>
    %256 = arith.addf %255, %254 : vector<2x50xf32>
    %257 = arith.negf %256 : vector<2x50xf32>
    %258 = math.exp %257 : vector<2x50xf32>
    %cst_83 = arith.constant 1.000000e+00 : f32
    %259 = vector.broadcast %cst_83 : f32 to vector<2x50xf32>
    %260 = arith.addf %259, %258 : vector<2x50xf32>
    %261 = arith.divf %259, %260 : vector<2x50xf32>
    %262 = vector.extract_strided_slice %26 {offsets = [0, 256], sizes = [1, 50], strides = [1, 1]} : vector<1x384xf32> to vector<1x50xf32>
    %263 = vector.extract_strided_slice %243 {offsets = [0, 256], sizes = [2, 50], strides = [1, 1]} : vector<2x384xf32> to vector<2x50xf32>
    %264 = arith.mulf %252, %263 : vector<2x50xf32>
    %265 = vector.broadcast %262 : vector<1x50xf32> to vector<2x50xf32>
    %266 = arith.addf %265, %264 : vector<2x50xf32>
    %267 = math.tanh %266 : vector<2x50xf32>
    %cst_84 = arith.constant 1.000000e+00 : f32
    %268 = vector.broadcast %cst_84 : f32 to vector<2x50xf32>
    %269 = arith.subf %268, %261 : vector<2x50xf32>
    %270 = arith.mulf %269, %267 : vector<2x50xf32>
    %271 = arith.mulf %261, %219 : vector<2x50xf32>
    %272 = arith.addf %270, %271 : vector<2x50xf32>
    %273 = vector.shape_cast %272 : vector<2x50xf32> to vector<2x1x50xf32>
    "tpu.trace_start"() <{level = 10 : i32, message = "bqd,bkd->bqk"}> : () -> ()
    %cst_85 = arith.constant dense<0.000000e+00> : vector<2x1x11xf32>
    %274 = tpu.matmul %273, %18, %cst_85 {dimension_numbers = #tpu.dot_dimension_numbers<[2], [2], [1], [1], [0, 0, 0, 1, 1, 1], [0], [0]>} : vector<2x1x50xf32>, vector<2x11x50xf32>, vector<2x1x11xf32> -> vector<2x1x11xf32>
    "tpu.trace_stop"() : () -> ()
    %275 = vector.shape_cast %274 : vector<2x1x11xf32> to vector<2x11xf32>
    %c0_86 = arith.constant 0 : index
    %c4 = arith.constant 4 : index
    %c0_87 = arith.constant 0 : index
    %276 = vector.load %arg3[%c0_86, %c4, %c0_87] : memref<2x5x11xf32, #tpu.memory_space<vmem>>, vector<2x1x11xf32>
    %277 = vector.shape_cast %276 : vector<2x1x11xf32> to vector<2x11xf32>
    %cst_88 = arith.constant 0.000000e+00 : f32
    %278 = vector.broadcast %cst_88 : f32 to vector<2x11xf32>
    %279 = arith.cmpf ogt, %277, %278 : vector<2x11xf32>
    %cst_89 = arith.constant -1.000000e+30 : f32
    %280 = vector.broadcast %cst_89 : f32 to vector<2x11xf32>
    %281 = arith.select %279, %280, %275 : vector<2x11xi1>, vector<2x11xf32>
    %cst_90 = arith.constant dense<0xFF800000> : vector<2xf32>
    %282 = vector.multi_reduction <maximumf>, %281, %cst_90 [1] : vector<2x11xf32> to vector<2xf32>
    %283 = vector.shape_cast %282 : vector<2xf32> to vector<2x1xf32>
    %284 = vector.broadcast %283 : vector<2x1xf32> to vector<2x11xf32>
    %285 = arith.subf %281, %284 : vector<2x11xf32>
    %286 = math.exp %285 : vector<2x11xf32>
    %cst_91 = arith.constant dense<0.000000e+00> : vector<2xf32>
    %287 = vector.multi_reduction <add>, %286, %cst_91 [1] : vector<2x11xf32> to vector<2xf32>
    %288 = vector.shape_cast %287 : vector<2xf32> to vector<2x1xf32>
    %289 = tpu.reciprocal %288 : vector<2x1xf32> -> vector<2x1xf32>
    %290 = vector.broadcast %289 : vector<2x1xf32> to vector<2x11xf32>
    %291 = arith.mulf %286, %290 : vector<2x11xf32>
    %292 = vector.shape_cast %291 : vector<2x11xf32> to vector<2x1x11xf32>
    %c0_92 = arith.constant 0 : index
    %c4_93 = arith.constant 4 : index
    %c0_94 = arith.constant 0 : index
    %293 = vector.load %arg13[%c0_92, %c4_93, %c0_94] : memref<2x5x11xf32, #tpu.memory_space<vmem>>, vector<2x1x11xf32>
    tpu.vector_store %arg13[%c0_92, %c4_93, %c0_94], %292 {strides = array<i32>} : memref<2x5x11xf32, #tpu.memory_space<vmem>>, vector<2x1x11xf32>,
    return
  }
  func.func @transform_0(%arg0: i32) -> (i32, i32) {
    %c0_i32 = arith.constant 0 : i32
    %c0_i32_0 = arith.constant 0 : i32
    %c0_i32_1 = arith.constant 0 : i32
    return %c0_i32, %c0_i32_0 : i32, i32
  }
  func.func @transform_1(%arg0: i32) -> (i32, i32, i32) {
    %c0_i32 = arith.constant 0 : i32
    %c0_i32_0 = arith.constant 0 : i32
    %c0_i32_1 = arith.constant 0 : i32
    %c0_i32_2 = arith.constant 0 : i32
    return %c0_i32, %c0_i32_0, %c0_i32_1 : i32, i32, i32
  }
  func.func @transform_2(%arg0: i32) -> (i32, i32, i32) {
    %c0_i32 = arith.constant 0 : i32
    %c0_i32_0 = arith.constant 0 : i32
    %c0_i32_1 = arith.constant 0 : i32
    %c0_i32_2 = arith.constant 0 : i32
    return %c0_i32, %c0_i32_0, %c0_i32_1 : i32, i32, i32
  }
  func.func @transform_3(%arg0: i32) -> (i32, i32) {
    %c0_i32 = arith.constant 0 : i32
    %c0_i32_0 = arith.constant 0 : i32
    %c0_i32_1 = arith.constant 0 : i32
    return %c0_i32, %c0_i32_0 : i32, i32
  }
  func.func @transform_4(%arg0: i32) -> (i32, i32) {
    %c0_i32 = arith.constant 0 : i32
    %c0_i32_0 = arith.constant 0 : i32
    %c0_i32_1 = arith.constant 0 : i32
    return %c0_i32, %c0_i32_0 : i32, i32
  }
  func.func @transform_5(%arg0: i32) -> (i32, i32) {
    %c0_i32 = arith.constant 0 : i32
    %c0_i32_0 = arith.constant 0 : i32
    %c0_i32_1 = arith.constant 0 : i32
    return %c0_i32, %c0_i32_0 : i32, i32
  }
  func.func @transform_6(%arg0: i32) -> (i32, i32) {
    %c0_i32 = arith.constant 0 : i32
    %c0_i32_0 = arith.constant 0 : i32
    %c0_i32_1 = arith.constant 0 : i32
    return %c0_i32, %c0_i32_0 : i32, i32
  }
  func.func @transform_7(%arg0: i32) -> (i32, i32) {
    %c0_i32 = arith.constant 0 : i32
    %c0_i32_0 = arith.constant 0 : i32
    %c0_i32_1 = arith.constant 0 : i32
    return %c0_i32, %c0_i32_0 : i32, i32
  }
  func.func @transform_8(%arg0: i32) -> (i32, i32) {
    %c0_i32 = arith.constant 0 : i32
    %c0_i32_0 = arith.constant 0 : i32
    %c0_i32_1 = arith.constant 0 : i32
    return %c0_i32, %c0_i32_0 : i32, i32
  }
  func.func @transform_9(%arg0: i32) -> (i32, i32) {
    %c0_i32 = arith.constant 0 : i32
    %c0_i32_0 = arith.constant 0 : i32
    %c0_i32_1 = arith.constant 0 : i32
    return %c0_i32, %c0_i32_0 : i32, i32
  }
  func.func @transform_10(%arg0: i32) -> (i32, i32) {
    %c0_i32 = arith.constant 0 : i32
    %c0_i32_0 = arith.constant 0 : i32
    %c0_i32_1 = arith.constant 0 : i32
    return %c0_i32, %c0_i32_0 : i32, i32
  }
  func.func @transform_11(%arg0: i32) -> (i32, i32) {
    %c0_i32 = arith.constant 0 : i32
    %c0_i32_0 = arith.constant 0 : i32
    %c0_i32_1 = arith.constant 0 : i32
    return %c0_i32, %c0_i32_0 : i32, i32
  }
  func.func @transform_12(%arg0: i32) -> (i32, i32, i32) {
    %c0_i32 = arith.constant 0 : i32
    %c0_i32_0 = arith.constant 0 : i32
    %c0_i32_1 = arith.constant 0 : i32
    %c0_i32_2 = arith.constant 0 : i32
    return %c0_i32, %c0_i32_0, %c0_i32_1 : i32, i32, i32
  }
}

</mosaic_0001>

<bundles_post_ra>
// kernel: splanner_forward.1
= control target key start
LH: loop header
LB: loop body
LE: loop exit
PB: predicated region body
PF: predicated region fallthrough
CT: control target
= control target key end

     0   :  { %v2814_v0 = vmov 0.0   ;;  %vm2815_vm0 = vmmov 0   ;;  %vm53_vm1 = vcmask 261120   ;;  %vm273_vm2 = vcmask 1041408   ;;  %s3642_s4 = inlined_call_operand.vmem [shape: f32[32,50], index: 4, kind: input, shape index: {}]   ;;  %s3643_s6 = inlined_call_operand.vmem [shape: f32[32,50], index: 6, kind: input, shape index: {}]   ;;  %s3644_s0 = inlined_call_operand.vmem [shape: f32[2,32], index: 0, kind: input, shape index: {}]   ;;  %s3645_s8 = inlined_call_operand.vmem [shape: f32[50,384], index: 8, kind: input, shape index: {}]   ;;  %s3646_s1 = inlined_call_operand.vmem [shape: f32[2,8,32], index: 1, kind: input, shape index: {}]   ;;  %s3647_s3 = inlined_call_operand.vmem [shape: f32[3,50], index: 3, kind: input, shape index: {}]   ;;  %s3648_s10 = inlined_call_operand.vmem [shape: f32[50,384], index: 10, kind: input, shape index: {}]   ;;  %s3649_s5 = inlined_call_operand.vmem [shape: f32[1,50], index: 5, kind: input, shape index: {}]   ;;  %s3650_s7 = inlined_call_operand.vmem [shape: f32[1,50], index: 7, kind: input, shape index: {}]   ;;  %s3651_s9 = inlined_call_operand.vmem [shape: f32[1,384], index: 9, kind: input, shape index: {}]   ;;  %s3652_s11 = inlined_call_operand.vmem [shape: f32[1,384], index: 11, kind: input, shape index: {}]   ;;  %s3653_s2 = inlined_call_operand.vmem [shape: f32[2,5,11], index: 2, kind: input, shape index: {}]   ;;  %s3654_s12 = inlined_call_operand.vmem [shape: f32[2,5,11], index: 12, kind: output, shape index: {}]  }
   0x1   :  { %2537 = vmatprep.subr.mxu0 %v2814_v0  ;;  %v45_v1 = vld [vmem:[%s3642_s4 + $0x18] sm:$0xff]  ;;  %v44_v2 = vld [vmem:[%s3642_s4 + $0x10] sm:$0xff]  ;;  %2545 = vmatprep.mubr.msk.f32.mxu0 %vm2815_vm0, %v2814_v0  ;;  %v43_v4 = vld [vmem:[%s3642_s4 + $0x8] sm:$0xff]  ;;  %vm269_vm3 = vcmask 408576   ;;  %vm228_vm4 = vcmask 1042432   ;;  %vm834_vm7 = vcmask 1041409  }
   0x2   :  { %2538 = vmatpush3.msra.mxu0 %v45_v1  ;;  %v132_v3 = vld [vmem:[%s3643_s6 + $0x18] sm:$0xff]  ;;  %v131_v5 = vld [vmem:[%s3643_s6 + $0x10] sm:$0xff]  ;;  %v130_v6 = vld [vmem:[%s3643_s6 + $0x8] sm:$0xff]  ;;  %vm837_vm8 = vcmask 82944   ;;  %vm866_vm15 = vcmask 81920  }
   0x3   :  { %2539 = vmatprep.subr.mxu0 %v2814_v0  ;;  %2548 = vmatprep.subr.mxu1 %v132_v3  ;;  %v42_v7 = vld [vmem:[%s3642_s4] sm:$0xff]  ;;  %v250_v10 = vld [vmem:[%s3645_s8 + $0x98] sm:$0x3]  ;;  %v249_v12 = vld [vmem:[%s3645_s8 + $0x90] sm:$0x3] }
   0x4   :  { %2540 = vmatpush3.msra.mxu0 %v44_v2  ;;  %2549 = vmatpush3.msra.mxu1 %v132_v3  ;;  %v41_v8 = vld [vmem:[%s3644_s0] sm:$0x3]  ;;  %v128_v13 = vld [vmem:[%s3646_s1 + $0x8] sm:$0xff]  ;;  %v246_v16 = vld [vmem:[%s3645_s8 + $0x78] sm:$0xff] }
   0x5   :  { %2541 = vmatprep.subr.mxu0 %v2814_v0  ;;  %2550 = vmatprep.subr.mxu1 %v131_v5  ;;  %v129_v9 = vld [vmem:[%s3643_s6] sm:$0xff]  ;;  %v244_v17 = vld [vmem:[%s3645_s8 + $0x68] sm:$0xff]  ;;  %v241_v20 = vld [vmem:[%s3645_s8 + $0x50] sm:$0xff] }
   0x6   :  { %2542 = vmatpush3.msra.mxu0 %v43_v4  ;;  %2551 = vmatpush3.msra.mxu1 %v131_v5  ;;  %v127_v11 = vld [vmem:[%s3646_s1] sm:$0xff]  ;;  %v248_v18 = vld [vmem:[%s3645_s8 + $0x88] sm:$0xff]  ;;  %v245_v21 = vld [vmem:[%s3645_s8 + $0x70] sm:$0xff] }
   0x7   :  { %2543 = vmatprep.subr.mxu0 %v2814_v0  ;;  %2552 = vmatprep.subr.mxu1 %v130_v6  ;;  %v247_v14 = vld [vmem:[%s3645_s8 + $0x80] sm:$0xff]  ;;  %v240_v22 = vld [vmem:[%s3645_s8 + $0x48] sm:$0xff]  ;;  %v238_v23 = vld [vmem:[%s3645_s8 + $0x38] sm:$0xff] }
   0x8   :  { %2544 = vmatpush3.msra.mxu0 %v42_v7  ;;  %2553 = vmatpush3.msra.mxu1 %v130_v6  ;;  %v251_v15 = vld [vmem:[%s3645_s8 + $0xa0] sm:$0x3]  ;;  %v242_v24 = vld [vmem:[%s3645_s8 + $0x58] sm:$0xff]  ;;  %v237_v25 = vld [vmem:[%s3645_s8 + $0x30] sm:$0xff]  ;;  %v254_v7 = vlaneseq }
   0x9   :  { %2546 = vmatmul.mubr.msk.f32.vlgmr.msra.gmra.mxu0 %vm53_vm1, %v41_v8  ;;  %2554 = vmatprep.subr.mxu1 %v129_v9  ;;  %v243_v19 = vld [vmem:[%s3645_s8 + $0x60] sm:$0xff]  ;;  %v234_v28 = vld [vmem:[%s3645_s8 + $0x18] sm:$0xff]  ;;  %v232_v29 = vld [vmem:[%s3645_s8 + $0x8] sm:$0xff] }
   0xa   :  { %2555 = vmatpush3.msra.mxu1 %v129_v9  ;;  %2378 = vmatprep.subr.msk.mxu0 %vm273_vm2, %v250_v10  ;;  %v235_v26 = vld [vmem:[%s3645_s8 + $0x20] sm:$0xff]  ;;  %v236_v30 = vld [vmem:[%s3645_s8 + $0x28] sm:$0xff]  ;;  %v233_v33 = vld [vmem:[%s3645_s8 + $0x10] sm:$0xff]  ;;  %v255_v8 = vshrl.u32 %v254_v7, 7 }
   0xb   :  { %2556 = vmatprep.mubr.msk.f32.mxu1 %vm53_vm1, %v127_v11  ;;  %2379 = vmatpush1.msk.msra.mxu0 %vm273_vm2, %v249_v12  ;;  %v239_v27 = vld [vmem:[%s3645_s8 + $0x40] sm:$0xff]  ;;  %v3005_v34 = vld [vmem:[%s3648_s10 + $0x98] sm:$0x3]  ;;  %v3013_v35 = vld [vmem:[%s3648_s10 + $0x90] sm:$0x3] }
   0xc   :  { %2559 = vmatprep.subr.mxu1 %v2814_v0  ;;  %2557 = vmatmul.mubr.msk.f32.vlgmr.msra.gmra.mxu1 %vm53_vm1, %v128_v13  ;;  %v231_v31 = vld [vmem:[%s3645_s8] sm:$0xff]  ;;  %v3033_v38 = vld [vmem:[%s3648_s10 + $0x78] sm:$0xff]  ;;  %v3042_v39 = vld [vmem:[%s3648_s10 + $0x88] sm:$0xff]  ;;  %v3191_v9 = vsub.s32 0, %v255_v8 }
   0xd   :  { %303 = vmatprep.subr.mxu0 %v247_v14  ;;  %2560 = vmatpush3.msk.msra.mxu1 %vm273_vm2, %v251_v15  ;;  %v2996_v32 = vld [vmem:[%s3647_s3] sm:$0x7]  ;;  %v3047_v40 = vld [vmem:[%s3648_s10 + $0x68] sm:$0xff]  ;;  %v3062_v42 = vld [vmem:[%s3648_s10 + $0x70] sm:$0xff]  ;;  %v260_v14 = vsub.s32 1, %v255_v8 }
   0xe   :  { %304 = vmatpush1.msra.mxu0 %v246_v16  ;;  %2561 = vmatprep.subr.mxu1 %v2814_v0  ;;  %v3020_v36 = vld [vmem:[%s3648_s10 + $0xa0] sm:$0x3]  ;;  %v3067_v43 = vld [vmem:[%s3648_s10 + $0x50] sm:$0xff]  ;;  %v3074_v44 = vld [vmem:[%s3648_s10 + $0x48] sm:$0xff] }
   0xf   :  { %305 = vmatprep.subr.mxu0 %v244_v17  ;;  %2562 = vmatpush3.msra.mxu1 %v248_v18  ;;  %v3025_v37 = vld [vmem:[%s3648_s10 + $0x80] sm:$0xff]  ;;  %v3081_v45 = vld [vmem:[%s3648_s10 + $0x58] sm:$0xff]  ;;  %v3093_v47 = vld [vmem:[%s3648_s10 + $0x30] sm:$0xff] }
  0x10   :  { %306 = vmatpush1.msra.mxu0 %v243_v19  ;;  %2563 = vmatprep.subr.mxu1 %v2814_v0  ;;  %v3055_v41 = vld [vmem:[%s3648_s10 + $0x60] sm:$0xff]  ;;  %v3086_v46 = vld [vmem:[%s3648_s10 + $0x38] sm:$0xff]  ;;  %v3125_v51 = vld [vmem:[%s3648_s10 + $0x28] sm:$0xff] }
  0x11   :  { %307 = vmatprep.subr.mxu0 %v241_v20  ;;  %2564 = vmatpush3.msra.mxu1 %v245_v21  ;;  %v3100_v48 = vld [vmem:[%s3648_s10 + $0x40] sm:$0xff]  ;;  %v3120_v50 = vld [vmem:[%s3648_s10 + $0x18] sm:$0xff]  ;;  %v3132_v52 = vld [vmem:[%s3648_s10 + $0x8] sm:$0xff] }
  0x12   :  { %308 = vmatpush1.msra.mxu0 %v240_v22  ;;  %2565 = vmatprep.subr.mxu1 %v2814_v0  ;;  %v3105_v49 = vld [vmem:[%s3648_s10 + $0x20] sm:$0xff]  ;;  %v3144_v54 = vld [vmem:[%s3648_s10 + $0x10] sm:$0xff] }
  0x13   :  { %309 = vmatprep.subr.mxu0 %v238_v23  ;;  %2566 = vmatpush3.msra.mxu1 %v242_v24  ;;  %v3139_v53 = vld [vmem:[%s3648_s10] sm:$0xff] }
  0x14   :  { %310 = vmatpush1.msra.mxu0 %v237_v25  ;;  %2567 = vmatprep.subr.mxu1 %v2814_v0  ;;  %v2373_v55 = vld [vmem:[%s3649_s5] ss:$0 sm:$0xff] }
  0x15   :  { %311 = vmatprep.subr.mxu0 %v235_v26  ;;  %2568 = vmatpush3.msra.mxu1 %v239_v27  ;;  %v2375_v58 = vld [vmem:[%s3650_s7] ss:$0 sm:$0xff] }
  0x16   :  { %312 = vmatpush1.msra.mxu0 %v234_v28  ;;  %2569 = vmatprep.subr.mxu1 %v2814_v0  ;;  %v252_v10 = vld [vmem:[%s3651_s9] sm:$0x7] }
  0x17   :  { %313 = vmatprep.subr.mxu0 %v232_v29  ;;  %2570 = vmatpush3.msra.mxu1 %v236_v30  ;;  %v257_v11 = vrot.slane %v252_v10, %v3191_v9  ;;  %v445_v13 = vld [vmem:[%s3652_s11] sm:$0x7]  ;;  %v261_v18 = vrot.slane %v252_v10, %v260_v14 }
  0x18   :  { %314 = vmatpush1.msra.mxu0 %v231_v31  ;;  %347 = vmatprep.mubr.f32.mxu0 %v2814_v0  ;;  %v3203_v16 = vrot.slane %v445_v13, %v3191_v9  ;;  %v3206_v22 = vrot.slane %v445_v13, %v260_v14 }
  0x19   :  { %2571 = vmatprep.subr.mxu1 %v2814_v0  ;;  %2380 = vmatmul.mubr.msk.f32.vlgmr.msra.gmra.mxu0 %vm269_vm3, %v2996_v32 }
  0x1a   :  { %2572 = vmatpush3.msra.mxu1 %v233_v33  ;;  %2573 = vmatprep.mubr.msk.f32.mxu1 %vm2815_vm0, %v2814_v0 }
  0x1b   :  { %2383 = vmatprep.subr.msk.mxu0 %vm273_vm2, %v3005_v34  ;;  %2576 = vmatprep.subr.mxu1 %v2814_v0 }
  0x1c   :  { %2574 = vmatmul.mubr.msk.f32.vlgmr.msra.gmra.mxu1 %vm269_vm3, %v2996_v32  ;;  %2384 = vmatpush1.msk.msra.mxu0 %vm273_vm2, %v3013_v35 }
  0x1d   :  { %2577 = vmatpush3.msk.msra.mxu1 %vm273_vm2, %v3020_v36  ;;  %494 = vmatprep.subr.mxu0 %v3025_v37 }
  0x1e   :  { %2578 = vmatprep.subr.mxu1 %v2814_v0  ;;  %495 = vmatpush1.msra.mxu0 %v3033_v38 }
  0x1f   :  { %2579 = vmatpush3.msra.mxu1 %v3042_v39  ;;  %496 = vmatprep.subr.mxu0 %v3047_v40 }
  0x20   :  { %2580 = vmatprep.subr.mxu1 %v2814_v0  ;;  %497 = vmatpush1.msra.mxu0 %v3055_v41 }
  0x21   :  { %2581 = vmatpush3.msra.mxu1 %v3062_v42  ;;  %498 = vmatprep.subr.mxu0 %v3067_v43 }
  0x22   :  { %2582 = vmatprep.subr.mxu1 %v2814_v0  ;;  %499 = vmatpush1.msra.mxu0 %v3074_v44 }
  0x23   :  { %2583 = vmatpush3.msra.mxu1 %v3081_v45  ;;  %500 = vmatprep.subr.mxu0 %v3086_v46 }
  0x24   :  { %2584 = vmatprep.subr.mxu1 %v2814_v0  ;;  %501 = vmatpush1.msra.mxu0 %v3093_v47 }
  0x25   :  { %2585 = vmatpush3.msra.mxu1 %v3100_v48  ;;  %502 = vmatprep.subr.mxu0 %v3105_v49 }
  0x26   :  { %2586 = vmatprep.subr.mxu1 %v2814_v0  ;;  %538 = vmatprep.mubr.f32.mxu0 %v2814_v0 }
  0x27   :  { %2590 = vmatprep.mubr.msk.f32.mxu1 %vm2815_vm0, %v2814_v0  ;;  %503 = vmatpush1.msra.mxu0 %v3120_v50 }
  0x28   :  { %2587 = vmatpush3.msra.mxu1 %v3125_v51  ;;  %504 = vmatprep.subr.mxu0 %v3132_v52 }
  0x29   :  { %2588 = vmatprep.subr.mxu1 %v2814_v0  ;;  %505 = vmatpush1.msra.mxu0 %v3139_v53 }
  0x2a   :  { %2589 = vmatpush3.msra.mxu1 %v3144_v54  ;;  %2593 = vmatprep.subr.mxu0 %v2814_v0 }
  0x2b   :  { %2600 = vmatprep.subr.mxu1 %v2814_v0 }
  0xc9   :  { %v123_v56 = vpop.f32.mrf.mxu0 }
  0xca   :  { %v3153_v57 = vadd.f32 %v2373_v55, %v123_v56  ;;  %v264_v56 = vsub.s32 2, %v255_v8 }
  0xcb   :  { %v2547_v59 = vpop.f32.mrf.mxu0 }
  0xcc   :  { %2385 = vmatmul.mubr.msk.f32.vlgmr.msra.gmra.mxu0 %vm269_vm3, %v3153_v57  ;;  %2591 = vmatmul.mubr.msk.f32.vlgmr.msra.gmra.mxu1 %vm269_vm3, %v3153_v57  ;;  %v2558_v60 = vpop.f32.mrf.mxu1 }
  0xcd   :  { %v218_v61 = vadd.f32 %v2558_v60, %v2375_v58  ;;  %2597 = vmatprep.mubr.msk.f32.mxu0 %vm2815_vm0, %v2814_v0  ;;  %2604 = vmatprep.mubr.msk.f32.mxu1 %vm2815_vm0, %v2814_v0  ;;  %v3213_v60 = vrot.slane %v445_v13, %v264_v56 }
  0xce   :  { %v212_v62 = vpop.f32.mrf.mxu1 }
  0xcf   :  { %v3166_v63 = vrot.slane %v218_v61, 5  ;;  %v213_v1 = vadd.f32 %v2375_v58, %v212_v62  ;;  %v265_v58 = vrot.slane %v252_v10, %v264_v56 }
  0xd1   :  { %v3168_v2 = vrot.slane %v213_v1, 5  ;;  %2601 = vmatpush3.xpose.msk.msra.mxu1 %vm269_vm3, %v3166_v63  ;;  %v3182_v6 = vsel %vm228_vm4, %v2996_v32, %v3166_v63 }
  0xd2   :  { %2602 = vmatprep.subr.mxu1 %v2814_v0 }
  0xd3   :  { %2594 = vmatpush3.xpose.msk.msra.mxu0 %vm269_vm3, %v3168_v2  ;;  %v3178_v5 = vsel %vm228_vm4, %v2996_v32, %v3168_v2 }
  0xd4   :  { %2595 = vmatprep.subr.mxu0 %v2814_v0 }
  0xd5   :  { %2603 = vmatpush3.xpose.msk.msra.mxu1 %vm269_vm3, %v3182_v6 }
  0xd6   :  { %2607 = vmatprep.subr.mxu1 %v2814_v0 }
  0xd7   :  { %2596 = vmatpush3.xpose.msk.msra.mxu0 %vm269_vm3, %v3178_v5 }
  0xd8   :  { %2396 = vmatprep.subr.msk.mxu0 %vm273_vm2, %v3005_v34 }
  0xd9   :  { %v349_v12 = vpop.f32.mrf.mxu0 }
  0xda   :  { %v3200_v15 = vadd.f32 %v349_v12, %v257_v11 }
  0xdb   :  { %v351_v17 = vpop.f32.mrf.mxu0 }
  0xdc   :  { %v420_v3 = vpop.f32.mrf.mxu1  ;;  %v618_v21 = vrot.slane %v3200_v15, %v260_v14  ;;  %v3209_v26 = vadd.f32 %v351_v17, %v261_v18  ;;  %v2816_v17 = vmov 1966171168  }
  0xdd   :  { %v3215_v61 = vadd.f32 %v420_v3, %v265_v58  ;;  %v650_v18 = vunpack.c.l.s4 %v2816_v17 }
  0xde   :  { %v2575_v4 = vpop.f32.mrf.mxu1  ;;  %v629_v30 = vrot.slane %v3209_v26, %v260_v14 }
  0xdf   :  { %v641_v7 = vrot.slane %v3215_v61, %v260_v14 }
 0x18c   :  { %v540_v19 = vpop.f32.mrf.mxu0  ;;  %v611_v20 = vpop.f32.mrf.mxu1 }
 0x18d   :  { %v541_v23 = vadd.f32 %v540_v19, %v3203_v16  ;;  %v612_v1 = vadd.f32 %v611_v20, %v3213_v60 }
 0x18e   :  { %v542_v24 = vpop.f32.mrf.mxu0  ;;  %v2592_v25 = vpop.f32.mrf.mxu1 }
 0x18f   :  { %v619_v27 = vadd.f32 %v618_v21, %v541_v23  ;;  %v543_v29 = vadd.f32 %v542_v24, %v3206_v22  ;;  %v651_v21 = vunpack.c.0.s8 %v650_v18 }
 0x191   :  { %v2388_v28 = vmul.f32 -1.442695, %v619_v27  ;;  %v630_v31 = vadd.f32 %v629_v30, %v543_v29  ;;  %v3219_v13 = vsub.s32 %v651_v21, %v255_v8  ;;  %v825_v8 = vld [vmem:[%s3653_s2] sm:$0x1]  ;;  %v3307_v21 = vrot.slane %v3209_v26, %v3191_v9 }
 0x192   :  { %vm827_vm6 = vcmp.gt.f32.partialorder %v825_v8, 0.0 }
 0x193   :  { %2734 = vpow2.f32 %v2388_v28  ;;  %v2389_v32 = vmul.f32 -1.442695, %v630_v31 }
 0x195   :  { %2736 = vpow2.f32 %v2389_v32 }
 0x1a0   :  { %v2735_v33 = vpop.eup %2734 }
 0x1a1   :  { %v623_v55 = vadd.f32 1.0, %v2735_v33 }
 0x1a2   :  { %v2737_v59 = vpop.eup %2736 }
 0x1a3   :  { %2738 = vrcp.f32 %v623_v55  ;;  %v634_v62 = vadd.f32 1.0, %v2737_v59 }
 0x1a5   :  { %2740 = vrcp.f32 %v634_v62 }
 0x1b0   :  { %v2739_v4 = vpop.eup %2738 }
 0x1b1   :  { %v637_v11 = vmul.f32 %v2739_v4, %v612_v1  ;;  %v3300_v1 = vrot.slane %v3200_v15, %v3191_v9 }
 0x1b2   :  { %v2741_v19 = vpop.eup %2740 }
 0x1b3   :  { %v642_v12 = vadd.f32 %v641_v7, %v637_v11  ;;  %v644_v10 = vsub.f32 1.0, %v2741_v19  ;;  %v646_v24 = vmul.f32 %v2741_v19, %v3153_v57  ;;  %v826_v57 = vld [vmem:[%s3653_s2 + $0x8] sm:$0x1] }
 0x1b4   :  { %vm828_vm5 = vcmp.gt.f32.partialorder %v826_v57, 0.0 }
 0x1b5   :  { %2742 = vtanh.f32 %v642_v12 }
 0x1c2   :  { %v2743_v23 = vpop.eup %2742 }
 0x1c3   :  { %v645_v3 = vmul.f32 %v2743_v23, %v644_v10 }
 0x1c5   :  { %v3222_v25 = vadd.f32 %v646_v24, %v645_v3 }
 0x1c7   :  { %v655_v14 = vrot.slane %v3222_v25, %v3219_v13 }
 0x1c9   :  { %v663_v20 = vrot.slane %v655_v14, %v3219_v13  ;;  %v656_v27 = vcombine.high %v655_v14, %v655_v14 }
 0x1cb   :  { %2598 = vmatmul.mubr.msk.f32.vlgmr.msra.gmra.mxu0 %vm269_vm3, %v663_v20  ;;  %v670_v28 = vrot.slane %v656_v27, %v3219_v13 }
 0x1cc   :  { %2397 = vmatpush1.msk.msra.mxu0 %vm273_vm2, %v3013_v35  ;;  %935 = vmatprep.mubr.f32.mxu0 %v2814_v0 }
 0x1cd   :  { %891 = vmatprep.subr.mxu0 %v3025_v37  ;;  %2605 = vmatmul.mubr.msk.f32.vlgmr.msra.gmra.mxu1 %vm269_vm3, %v670_v28  ;;  %v3313_v28 = vrot.slane %v3215_v61, %v3191_v9 }
 0x1ce   :  { %892 = vmatpush1.msra.mxu0 %v3033_v38  ;;  %2608 = vmatpush3.msk.msra.mxu1 %vm273_vm2, %v3020_v36 }
 0x1cf   :  { %893 = vmatprep.subr.mxu0 %v3047_v40  ;;  %2609 = vmatprep.subr.mxu1 %v2814_v0 }
 0x1d0   :  { %894 = vmatpush1.msra.mxu0 %v3055_v41  ;;  %2610 = vmatpush3.msra.mxu1 %v3042_v39 }
 0x1d1   :  { %895 = vmatprep.subr.mxu0 %v3067_v43  ;;  %2611 = vmatprep.subr.mxu1 %v2814_v0 }
 0x1d2   :  { %896 = vmatpush1.msra.mxu0 %v3074_v44  ;;  %2612 = vmatpush3.msra.mxu1 %v3062_v42 }
 0x1d3   :  { %897 = vmatprep.subr.mxu0 %v3086_v46  ;;  %2613 = vmatprep.subr.mxu1 %v2814_v0 }
 0x1d4   :  { %898 = vmatpush1.msra.mxu0 %v3093_v47  ;;  %2614 = vmatpush3.msra.mxu1 %v3081_v45 }
 0x1d5   :  { %899 = vmatprep.subr.mxu0 %v3105_v49  ;;  %2615 = vmatprep.subr.mxu1 %v2814_v0 }
 0x1d6   :  { %900 = vmatpush1.msra.mxu0 %v3120_v50  ;;  %2616 = vmatpush3.msra.mxu1 %v3100_v48 }
 0x1d7   :  { %901 = vmatprep.subr.mxu0 %v3132_v52  ;;  %2617 = vmatprep.subr.mxu1 %v2814_v0 }
 0x1d8   :  { %902 = vmatpush1.msra.mxu0 %v3139_v53  ;;  %2618 = vmatpush3.msra.mxu1 %v3125_v51 }
 0x1d9   :  { %2398 = vmatmul.mubr.msk.f32.vlgmr.msra.gmra.mxu0 %vm269_vm3, %v3222_v25  ;;  %2619 = vmatprep.subr.mxu1 %v2814_v0 }
 0x1da   :  { %2624 = vmatprep.subr.mxu0 %v2814_v0  ;;  %2620 = vmatpush3.msra.mxu1 %v3144_v54 }
 0x1db   :  { %2621 = vmatprep.mubr.msk.f32.mxu1 %vm2815_vm0, %v2814_v0  ;;  %2625 = vmatpush3.xpose.msk.msra.mxu0 %vm269_vm3, %v3168_v2 }
 0x1dc   :  { %2622 = vmatmul.mubr.msk.f32.vlgmr.msra.gmra.mxu1 %vm269_vm3, %v3222_v25  ;;  %2631 = vmatprep.subr.mxu1 %v2814_v0 }
 0x1dd   :  { %2632 = vmatpush3.xpose.msk.msra.mxu1 %vm269_vm3, %v3166_v63  ;;  %2626 = vmatprep.subr.mxu0 %v2814_v0 }
 0x1de   :  { %2633 = vmatprep.subr.mxu1 %v2814_v0  ;;  %2628 = vmatprep.mubr.msk.f32.mxu0 %vm2815_vm0, %v2814_v0 }
 0x1df   :  { %2627 = vmatpush3.xpose.msk.msra.mxu0 %vm269_vm3, %v3178_v5  ;;  %2635 = vmatprep.mubr.msk.f32.mxu1 %vm2815_vm0, %v2814_v0 }
 0x1e0   :  { %2409 = vmatprep.subr.msk.mxu0 %vm273_vm2, %v3005_v34 }
 0x1e1   :  { %2634 = vmatpush3.xpose.msk.msra.mxu1 %vm269_vm3, %v3182_v6 }
 0x1e2   :  { %2638 = vmatprep.subr.mxu1 %v2814_v0 }
 0x28b   :  { %v744_v29 = vpop.f32.mrf.mxu0 }
 0x28c   :  { %v3293_v56 = vsel %vm827_vm6, -1e+30, %v744_v29 }
 0x28d   :  { %v2599_v30 = vpop.f32.mrf.mxu0  ;;  %v821_v31 = vpop.f32.mrf.mxu1 }
 0x28e   :  { %v3290_v32 = vsel %vm828_vm5, -1e+30, %v821_v31 }
 0x28f   :  { %v833_v33 = vrot.slane %v3290_v32, 7  ;;  %v2606_v55 = vpop.f32.mrf.mxu1 }
 0x291   :  { %v835_v58 = vsel %vm834_vm7, %v833_v33, %v3293_v56 }
 0x292   :  { %v838_v59 = vsel %vm837_vm8, %v835_v58, -inf }
 0x293   :  { %839 = vmax.xlane.f32.xlu0 %v838_v59 }
 0x299   :  { %v937_v62 = vpop.f32.mrf.mxu0 }
 0x29a   :  { %v938_v4 = vadd.f32 %v937_v62, %v3203_v16  ;;  %v1212_v62 = vld [vmem:[%s3653_s2 + $0x1] sm:$0x1] }
 0x29b   :  { %v939_v7 = vpop.f32.mrf.mxu0  ;;  %vm1214_vm10 = vcmp.gt.f32.partialorder %v1212_v62, 0.0 }
 0x29c   :  { %v1016_v11 = vadd.f32 %v3300_v1, %v938_v4  ;;  %v1008_v12 = vpop.f32.mrf.mxu1  ;;  %v940_v18 = vadd.f32 %v939_v7, %v3206_v22 }
 0x29d   :  { %v1009_v20 = vadd.f32 %v1008_v12, %v3213_v60 }
 0x29e   :  { %v2401_v17 = vmul.f32 -1.442695, %v1016_v11  ;;  %v2623_v19 = vpop.f32.mrf.mxu1  ;;  %v1027_v10 = vadd.f32 %v3307_v21, %v940_v18 }
 0x2a0   :  { %2744 = vpow2.f32 %v2401_v17  ;;  %v2402_v23 = vmul.f32 -1.442695, %v1027_v10 }
 0x2a2   :  { %2746 = vpow2.f32 %v2402_v23 }
 0x2ad   :  { %v2745_v15 = vpop.eup %2744 }
 0x2ae   :  { %v1020_v3 = vadd.f32 1.0, %v2745_v15 }
 0x2af   :  { %v2747_v24 = vpop.eup %2746 }
 0x2b0   :  { %2748 = vrcp.f32 %v1020_v3  ;;  %v1031_v14 = vadd.f32 1.0, %v2747_v24 }
 0x2b2   :  { %2750 = vrcp.f32 %v1031_v14 }
 0x2bd   :  { %v2749_v27 = vpop.eup %2748 }
 0x2be   :  { %v1034_v26 = vmul.f32 %v2749_v27, %v1009_v20 }
 0x2bf   :  { %v2751_v8 = vpop.eup %2750 }
 0x2c0   :  { %v1039_v57 = vadd.f32 %v3313_v28, %v1034_v26  ;;  %v1041_v29 = vsub.f32 1.0, %v2751_v8  ;;  %v1043_v31 = vmul.f32 %v2751_v8, %v3222_v25  ;;  %v1213_v25 = vld [vmem:[%s3653_s2 + $0x9] sm:$0x1] }
 0x2c1   :  { %vm1215_vm9 = vcmp.gt.f32.partialorder %v1213_v25, 0.0 }
 0x2c2   :  { %2752 = vtanh.f32 %v1039_v57 }
 0x2cf   :  { %v2753_v30 = vpop.eup %2752 }
 0x2d0   :  { %v1042_v33 = vmul.f32 %v2753_v30, %v1041_v29 }
 0x2d2   :  { %v3317_v55 = vadd.f32 %v1043_v31, %v1042_v33 }
 0x2d4   :  { %v1052_v58 = vrot.slane %v3317_v55, %v3219_v13 }
 0x2d6   :  { %v1060_v59 = vrot.slane %v1052_v58, %v3219_v13  ;;  %v1053_v9 = vcombine.high %v1052_v58, %v1052_v58 }
 0x2d8   :  { %2629 = vmatmul.mubr.msk.f32.vlgmr.msra.gmra.mxu0 %vm269_vm3, %v1060_v59  ;;  %v1067_v61 = vrot.slane %v1053_v9, %v3219_v13 }
 0x2d9   :  { %2410 = vmatpush1.msk.msra.mxu0 %vm273_vm2, %v3013_v35  ;;  %1319 = vmatprep.mubr.f32.mxu0 %v2814_v0 }
 0x2da   :  { %1275 = vmatprep.subr.mxu0 %v3025_v37  ;;  %2636 = vmatmul.mubr.msk.f32.vlgmr.msra.gmra.mxu1 %vm269_vm3, %v1067_v61 }
 0x2db   :  { %1276 = vmatpush1.msra.mxu0 %v3033_v38  ;;  %2639 = vmatpush3.msk.msra.mxu1 %vm273_vm2, %v3020_v36 }
 0x2dc   :  { %1277 = vmatprep.subr.mxu0 %v3047_v40  ;;  %2640 = vmatprep.subr.mxu1 %v2814_v0 }
 0x2dd   :  { %1278 = vmatpush1.msra.mxu0 %v3055_v41  ;;  %2641 = vmatpush3.msra.mxu1 %v3042_v39 }
 0x2de   :  { %1279 = vmatprep.subr.mxu0 %v3067_v43  ;;  %2642 = vmatprep.subr.mxu1 %v2814_v0 }
 0x2df   :  { %1280 = vmatpush1.msra.mxu0 %v3074_v44  ;;  %2643 = vmatpush3.msra.mxu1 %v3062_v42 }
 0x2e0   :  { %1281 = vmatprep.subr.mxu0 %v3086_v46  ;;  %2644 = vmatprep.subr.mxu1 %v2814_v0 }
 0x2e1   :  { %1282 = vmatpush1.msra.mxu0 %v3093_v47  ;;  %2645 = vmatpush3.msra.mxu1 %v3081_v45 }
 0x2e2   :  { %1283 = vmatprep.subr.mxu0 %v3105_v49  ;;  %2646 = vmatprep.subr.mxu1 %v2814_v0 }
 0x2e3   :  { %1284 = vmatpush1.msra.mxu0 %v3120_v50  ;;  %2647 = vmatpush3.msra.mxu1 %v3100_v48 }
 0x2e4   :  { %1285 = vmatprep.subr.mxu0 %v3132_v52  ;;  %2648 = vmatprep.subr.mxu1 %v2814_v0 }
 0x2e5   :  { %1286 = vmatpush1.msra.mxu0 %v3139_v53  ;;  %2649 = vmatpush3.msra.mxu1 %v3125_v51 }
 0x2e6   :  { %2411 = vmatmul.mubr.msk.f32.vlgmr.msra.gmra.mxu0 %vm269_vm3, %v3317_v55  ;;  %2650 = vmatprep.subr.mxu1 %v2814_v0 }
 0x2e7   :  { %2655 = vmatprep.subr.mxu0 %v2814_v0  ;;  %2651 = vmatpush3.msra.mxu1 %v3144_v54 }
 0x2e8   :  { %2652 = vmatprep.mubr.msk.f32.mxu1 %vm2815_vm0, %v2814_v0  ;;  %2656 = vmatpush3.xpose.msk.msra.mxu0 %vm269_vm3, %v3168_v2 }
 0x2e9   :  { %2653 = vmatmul.mubr.msk.f32.vlgmr.msra.gmra.mxu1 %vm269_vm3, %v3317_v55  ;;  %2662 = vmatprep.subr.mxu1 %v2814_v0 }
 0x2ea   :  { %2663 = vmatpush3.xpose.msk.msra.mxu1 %vm269_vm3, %v3166_v63  ;;  %2657 = vmatprep.subr.mxu0 %v2814_v0 }
 0x2eb   :  { %2664 = vmatprep.subr.mxu1 %v2814_v0  ;;  %2659 = vmatprep.mubr.msk.f32.mxu0 %vm2815_vm0, %v2814_v0 }
 0x2ec   :  { %2658 = vmatpush3.xpose.msk.msra.mxu0 %vm269_vm3, %v3178_v5  ;;  %2666 = vmatprep.mubr.msk.f32.mxu1 %vm2815_vm0, %v2814_v0 }
 0x2ed   :  { %2422 = vmatprep.subr.msk.mxu0 %vm273_vm2, %v3005_v34 }
 0x2ee   :  { %2665 = vmatpush3.xpose.msk.msra.mxu1 %vm269_vm3, %v3182_v6 }
 0x2ef   :  { %2669 = vmatprep.subr.mxu1 %v2814_v0 }
 0x398   :  { %v1136_v4 = vpop.f32.mrf.mxu0 }
 0x399   :  { %v3388_v19 = vsel %vm1214_vm10, -1e+30, %v1136_v4 }
 0x39a   :  { %v2630_v7 = vpop.f32.mrf.mxu0  ;;  %v1208_v11 = vpop.f32.mrf.mxu1 }
 0x39b   :  { %v3385_v12 = vsel %vm1215_vm9, -1e+30, %v1208_v11 }
 0x39c   :  { %v1220_v17 = vrot.slane %v3385_v12, 7  ;;  %v2637_v18 = vpop.f32.mrf.mxu1 }
 0x39e   :  { %v1221_v10 = vsel %vm834_vm7, %v1220_v17, %v3388_v19 }
 0x39f   :  { %v1223_v23 = vsel %vm837_vm8, %v1221_v10, -inf }
 0x3a0   :  { %1224 = vmax.xlane.f32.xlu0 %v1223_v23 }
 0x3a6   :  { %v1321_v15 = vpop.f32.mrf.mxu0 }
 0x3a7   :  { %v1322_v3 = vadd.f32 %v1321_v15, %v3203_v16 }
 0x3a8   :  { %v1323_v24 = vpop.f32.mrf.mxu0 }
 0x3a9   :  { %v1396_v14 = vadd.f32 %v1322_v3, %v3300_v1  ;;  %v1392_v20 = vpop.f32.mrf.mxu1  ;;  %v1324_v26 = vadd.f32 %v1323_v24, %v3206_v22  ;;  %v1584_v24 = vld [vmem:[%s3653_s2 + $0x2] sm:$0x1] }
 0x3aa   :  { %v1393_v59 = vadd.f32 %v1392_v20, %v3213_v60  ;;  %vm1586_vm12 = vcmp.gt.f32.partialorder %v1584_v24, 0.0 }
 0x3ab   :  { %v2414_v27 = vmul.f32 -1.442695, %v1396_v14  ;;  %v2654_v57 = vpop.f32.mrf.mxu1  ;;  %v1403_v8 = vadd.f32 %v1324_v26, %v3307_v21 }
 0x3ad   :  { %2754 = vpow2.f32 %v2414_v27  ;;  %v2415_v29 = vmul.f32 -1.442695, %v1403_v8 }
 0x3af   :  { %2756 = vpow2.f32 %v2415_v29 }
 0x3ba   :  { %v2755_v30 = vpop.eup %2754 }
 0x3bb   :  { %v1400_v31 = vadd.f32 1.0, %v2755_v30 }
 0x3bc   :  { %v2757_v33 = vpop.eup %2756 }
 0x3bd   :  { %2758 = vrcp.f32 %v1400_v31  ;;  %v1407_v58 = vadd.f32 1.0, %v2757_v33 }
 0x3bf   :  { %2760 = vrcp.f32 %v1407_v58 }
 0x3ca   :  { %v2759_v9 = vpop.eup %2758 }
 0x3cb   :  { %v1410_v61 = vmul.f32 %v2759_v9, %v1393_v59 }
 0x3cc   :  { %v2761_v62 = vpop.eup %2760 }
 0x3cd   :  { %v1411_v25 = vadd.f32 %v1410_v61, %v3313_v28  ;;  %v1413_v4 = vsub.f32 1.0, %v2761_v62  ;;  %v1415_v11 = vmul.f32 %v2761_v62, %v3317_v55  ;;  %v1585_v55 = vld [vmem:[%s3653_s2 + $0xa] sm:$0x1] }
 0x3ce   :  { %vm1587_vm11 = vcmp.gt.f32.partialorder %v1585_v55, 0.0 }
 0x3cf   :  { %2762 = vtanh.f32 %v1411_v25 }
 0x3dc   :  { %v2763_v7 = vpop.eup %2762 }
 0x3dd   :  { %v1414_v17 = vmul.f32 %v2763_v7, %v1413_v4 }
 0x3df   :  { %v3400_v18 = vadd.f32 %v1415_v11, %v1414_v17 }
 0x3e1   :  { %v1424_v10 = vrot.slane %v3400_v18, %v3219_v13 }
 0x3e3   :  { %v1432_v23 = vrot.slane %v1424_v10, %v3219_v13  ;;  %v1425_v15 = vcombine.high %v1424_v10, %v1424_v10 }
 0x3e5   :  { %2660 = vmatmul.mubr.msk.f32.vlgmr.msra.gmra.mxu0 %vm269_vm3, %v1432_v23  ;;  %v1439_v3 = vrot.slane %v1425_v15, %v3219_v13 }
 0x3e6   :  { %2423 = vmatpush1.msk.msra.mxu0 %vm273_vm2, %v3013_v35  ;;  %1691 = vmatprep.mubr.f32.mxu0 %v2814_v0 }
 0x3e7   :  { %1647 = vmatprep.subr.mxu0 %v3025_v37  ;;  %2667 = vmatmul.mubr.msk.f32.vlgmr.msra.gmra.mxu1 %vm269_vm3, %v1439_v3 }
 0x3e8   :  { %1648 = vmatpush1.msra.mxu0 %v3033_v38  ;;  %2670 = vmatpush3.msk.msra.mxu1 %vm273_vm2, %v3020_v36 }
 0x3e9   :  { %1649 = vmatprep.subr.mxu0 %v3047_v40  ;;  %2671 = vmatprep.subr.mxu1 %v2814_v0 }
 0x3ea   :  { %1650 = vmatpush1.msra.mxu0 %v3055_v41  ;;  %2672 = vmatpush3.msra.mxu1 %v3042_v39 }
 0x3eb   :  { %1651 = vmatprep.subr.mxu0 %v3067_v43  ;;  %2673 = vmatprep.subr.mxu1 %v2814_v0 }
 0x3ec   :  { %1652 = vmatpush1.msra.mxu0 %v3074_v44  ;;  %2674 = vmatpush3.msra.mxu1 %v3062_v42 }
 0x3ed   :  { %1653 = vmatprep.subr.mxu0 %v3086_v46  ;;  %2675 = vmatprep.subr.mxu1 %v2814_v0 }
 0x3ee   :  { %1654 = vmatpush1.msra.mxu0 %v3093_v47  ;;  %2676 = vmatpush3.msra.mxu1 %v3081_v45 }
 0x3ef   :  { %1655 = vmatprep.subr.mxu0 %v3105_v49  ;;  %2677 = vmatprep.subr.mxu1 %v2814_v0 }
 0x3f0   :  { %1656 = vmatpush1.msra.mxu0 %v3120_v50  ;;  %2678 = vmatpush3.msra.mxu1 %v3100_v48 }
 0x3f1   :  { %1657 = vmatprep.subr.mxu0 %v3132_v52  ;;  %2679 = vmatprep.subr.mxu1 %v2814_v0 }
 0x3f2   :  { %1658 = vmatpush1.msra.mxu0 %v3139_v53  ;;  %2680 = vmatpush3.msra.mxu1 %v3125_v51 }
 0x3f3   :  { %2424 = vmatmul.mubr.msk.f32.vlgmr.msra.gmra.mxu0 %vm269_vm3, %v3400_v18  ;;  %2681 = vmatprep.subr.mxu1 %v2814_v0 }
 0x3f4   :  { %2686 = vmatprep.subr.mxu0 %v2814_v0  ;;  %2682 = vmatpush3.msra.mxu1 %v3144_v54 }
 0x3f5   :  { %2683 = vmatprep.mubr.msk.f32.mxu1 %vm2815_vm0, %v2814_v0  ;;  %2687 = vmatpush3.xpose.msk.msra.mxu0 %vm269_vm3, %v3168_v2 }
 0x3f6   :  { %2684 = vmatmul.mubr.msk.f32.vlgmr.msra.gmra.mxu1 %vm269_vm3, %v3400_v18  ;;  %2693 = vmatprep.subr.mxu1 %v2814_v0 }
 0x3f7   :  { %2694 = vmatpush3.xpose.msk.msra.mxu1 %vm269_vm3, %v3166_v63  ;;  %2688 = vmatprep.subr.mxu0 %v2814_v0 }
 0x3f8   :  { %2695 = vmatprep.subr.mxu1 %v2814_v0  ;;  %2690 = vmatprep.mubr.msk.f32.mxu0 %vm2815_vm0, %v2814_v0 }
 0x3f9   :  { %2689 = vmatpush3.xpose.msk.msra.mxu0 %vm269_vm3, %v3178_v5  ;;  %2697 = vmatprep.mubr.msk.f32.mxu1 %vm2815_vm0, %v2814_v0 }
 0x3fa   :  { %2435 = vmatprep.subr.msk.mxu0 %vm273_vm2, %v3005_v34 }
 0x3fb   :  { %2696 = vmatpush3.xpose.msk.msra.mxu1 %vm269_vm3, %v3182_v6 }
 0x3fc   :  { %2700 = vmatprep.subr.mxu1 %v2814_v0 }
 0x4a5   :  { %v1508_v14 = vpop.f32.mrf.mxu0 }
 0x4a6   :  { %v3471_v8 = vsel %vm1586_vm12, -1e+30, %v1508_v14 }
 0x4a7   :  { %v2661_v20 = vpop.f32.mrf.mxu0  ;;  %v1580_v27 = vpop.f32.mrf.mxu1 }
 0x4a8   :  { %v3468_v26 = vsel %vm1587_vm11, -1e+30, %v1580_v27 }
 0x4a9   :  { %v1592_v34 = vrot.slane %v3468_v26, 7  ;;  %v2668_v57 = vpop.f32.mrf.mxu1 }
 0x4ab   :  { %v1593_v29 = vsel %vm834_vm7, %v1592_v34, %v3471_v8 }
 0x4ac   :  { %v1595_v30 = vsel %vm837_vm8, %v1593_v29, -inf }
 0x4ad   :  { %1596 = vmax.xlane.f32.xlu1 %v1595_v30 }
 0x4b3   :  { %v1693_v31 = vpop.f32.mrf.mxu0 }
 0x4b4   :  { %v1694_v33 = vadd.f32 %v1693_v31, %v3203_v16 }
 0x4b5   :  { %v1695_v58 = vpop.f32.mrf.mxu0 }
 0x4b6   :  { %v1768_v59 = vadd.f32 %v1694_v33, %v3300_v1  ;;  %v1764_v9 = vpop.f32.mrf.mxu1  ;;  %v1696_v25 = vadd.f32 %v1695_v58, %v3206_v22 }
 0x4b7   :  { %v1765_v15 = vadd.f32 %v1764_v9, %v3213_v60 }
 0x4b8   :  { %v2427_v61 = vmul.f32 -1.442695, %v1768_v59  ;;  %v2685_v62 = vpop.f32.mrf.mxu1  ;;  %v1775_v4 = vadd.f32 %v1696_v25, %v3307_v21 }
 0x4ba   :  { %2764 = vpow2.f32 %v2427_v61  ;;  %v2428_v7 = vmul.f32 -1.442695, %v1775_v4 }
 0x4bc   :  { %2766 = vpow2.f32 %v2428_v7 }
 0x4c7   :  { %v2765_v11 = vpop.eup %2764 }
 0x4c8   :  { %v1772_v17 = vadd.f32 1.0, %v2765_v11 }
 0x4c9   :  { %v2767_v10 = vpop.eup %2766 }
 0x4ca   :  { %2768 = vrcp.f32 %v1772_v17  ;;  %v1779_v23 = vadd.f32 1.0, %v2767_v10 }
 0x4cc   :  { %2770 = vrcp.f32 %v1779_v23 }
 0x4d7   :  { %v2769_v3 = vpop.eup %2768 }
 0x4d8   :  { %v1782_v55 = vmul.f32 %v2769_v3, %v1765_v15 }
 0x4d9   :  { %v2771_v14 = vpop.eup %2770 }
 0x4da   :  { %v1783_v24 = vadd.f32 %v1782_v55, %v3313_v28  ;;  %v1785_v20 = vsub.f32 1.0, %v2771_v14  ;;  %v1787_v34 = vmul.f32 %v2771_v14, %v3400_v18 }
 0x4dc   :  { %2772 = vtanh.f32 %v1783_v24 }
 0x4e9   :  { %v2773_v27 = vpop.eup %2772 }
 0x4ea   :  { %v1786_v57 = vmul.f32 %v2773_v27, %v1785_v20 }
 0x4ec   :  { %v3483_v29 = vadd.f32 %v1787_v34, %v1786_v57 }
 0x4ee   :  { %v1796_v30 = vrot.slane %v3483_v29, %v3219_v13 }
 0x4f0   :  { %v1804_v31 = vrot.slane %v1796_v30, %v3219_v13  ;;  %v1797_v33 = vcombine.high %v1796_v30, %v1796_v30 }
 0x4f2   :  { %2691 = vmatmul.mubr.msk.f32.vlgmr.msra.gmra.mxu0 %vm269_vm3, %v1804_v31  ;;  %v1811_v58 = vrot.slane %v1797_v33, %v3219_v13 }
 0x4f3   :  { %2436 = vmatpush1.msk.msra.mxu0 %vm273_vm2, %v3013_v35  ;;  %2063 = vmatprep.mubr.f32.mxu0 %v2814_v0  ;;  %v840_v35 = vpop.xlane.xlu0 %839 }
 0x4f4   :  { %2019 = vmatprep.subr.mxu0 %v3025_v37  ;;  %2698 = vmatmul.mubr.msk.f32.vlgmr.msra.gmra.mxu1 %vm269_vm3, %v1811_v58 }
 0x4f5   :  { %2020 = vmatpush1.msra.mxu0 %v3033_v38  ;;  %2701 = vmatpush3.msk.msra.mxu1 %vm273_vm2, %v3020_v36  ;;  %v842_v36 = vrot.slane %v840_v35, 1 }
 0x4f6   :  { %2021 = vmatprep.subr.mxu0 %v3047_v40  ;;  %2702 = vmatprep.subr.mxu1 %v2814_v0 }
 0x4f7   :  { %2022 = vmatpush1.msra.mxu0 %v3055_v41  ;;  %2703 = vmatpush3.msra.mxu1 %v3042_v39  ;;  %v846_v38 = vsub.f32 %v3290_v32, %v842_v36 }
 0x4f8   :  { %2023 = vmatprep.subr.mxu0 %v3067_v43  ;;  %2704 = vmatprep.subr.mxu1 %v2814_v0 }
 0x4f9   :  { %2024 = vmatpush1.msra.mxu0 %v3074_v44  ;;  %2705 = vmatpush3.msra.mxu1 %v3062_v42  ;;  %v849_v40 = vmul.f32 1.442695, %v846_v38  ;;  %v845_v42 = vsub.f32 %v3293_v56, %v840_v35 }
 0x4fa   :  { %2025 = vmatprep.subr.mxu0 %v3086_v46  ;;  %2706 = vmatprep.subr.mxu1 %v2814_v0  ;;  %v1957_v46 = vld [vmem:[%s3653_s2 + $0xb] sm:$0x1] }
 0x4fb   :  { %2026 = vmatpush1.msra.mxu0 %v3093_v47  ;;  %2707 = vmatpush3.msra.mxu1 %v3081_v45  ;;  %2774 = vpow2.f32 %v849_v40  ;;  %v847_v44 = vmul.f32 1.442695, %v845_v42  ;;  %v1956_v47 = vld [vmem:[%s3653_s2 + $0x3] sm:$0x1]  ;;  %vm1959_vm13 = vcmp.gt.f32.partialorder %v1957_v46, 0.0 }
 0x4fc   :  { %2027 = vmatprep.subr.mxu0 %v3105_v49  ;;  %2708 = vmatprep.subr.mxu1 %v2814_v0  ;;  %vm1958_vm14 = vcmp.gt.f32.partialorder %v1956_v47, 0.0 }
 0x4fd   :  { %2028 = vmatpush1.msra.mxu0 %v3120_v50  ;;  %2709 = vmatpush3.msra.mxu1 %v3100_v48 }
 0x4fe   :  { %2029 = vmatprep.subr.mxu0 %v3132_v52  ;;  %2710 = vmatprep.subr.mxu1 %v2814_v0 }
 0x4ff   :  { %2030 = vmatpush1.msra.mxu0 %v3139_v53  ;;  %2711 = vmatpush3.msra.mxu1 %v3125_v51 }
 0x500   :  { %2437 = vmatmul.mubr.msk.f32.vlgmr.msra.gmra.mxu0 %vm269_vm3, %v3483_v29  ;;  %2712 = vmatprep.subr.mxu1 %v2814_v0 }
 0x501   :  { %2717 = vmatprep.subr.mxu0 %v2814_v0  ;;  %2713 = vmatpush3.msra.mxu1 %v3144_v54 }
 0x502   :  { %2714 = vmatprep.mubr.msk.f32.mxu1 %vm2815_vm0, %v2814_v0  ;;  %2718 = vmatpush3.xpose.msk.msra.mxu0 %vm269_vm3, %v3168_v2 }
 0x503   :  { %2715 = vmatmul.mubr.msk.f32.vlgmr.msra.gmra.mxu1 %vm269_vm3, %v3483_v29  ;;  %2724 = vmatprep.subr.mxu1 %v2814_v0 }
 0x504   :  { %2725 = vmatpush3.xpose.msk.msra.mxu1 %vm269_vm3, %v3166_v63  ;;  %2719 = vmatprep.subr.mxu0 %v2814_v0 }
 0x505   :  { %2726 = vmatprep.subr.mxu1 %v2814_v0  ;;  %2721 = vmatprep.mubr.msk.f32.mxu0 %vm2815_vm0, %v2814_v0 }
 0x506   :  { %2720 = vmatpush3.xpose.msk.msra.mxu0 %vm269_vm3, %v3178_v5  ;;  %2728 = vmatprep.mubr.msk.f32.mxu1 %vm2815_vm0, %v2814_v0 }
 0x508   :  { %2727 = vmatpush3.xpose.msk.msra.mxu1 %vm269_vm3, %v3182_v6  ;;  %v3552_v49 = vpop.eup %2774 }
 0x509   :  { %v853_v63 = vrot.slane %v3552_v49, 7 }
 0x536   :  { %v1597_v37 = vpop.xlane.xlu1 %1596 }
 0x537   :  { %v1599_v39 = vrot.slane %v1597_v37, 1  ;;  %v1602_v45 = vsub.f32 %v3471_v8, %v1597_v37 }
 0x539   :  { %v1603_v41 = vsub.f32 %v3468_v26, %v1599_v39  ;;  %v1604_v0 = vmul.f32 1.442695, %v1602_v45  ;;  %v1225_v45 = vpop.xlane.xlu0 %1224 }
 0x53b   :  { %v1606_v43 = vmul.f32 1.442695, %v1603_v41 }
 0x53d   :  { %2776 = vpow2.f32 %v1606_v43 }
 0x53e   :  { %2778 = vpow2.f32 %v847_v44 }
 0x53f   :  { %2780 = vpow2.f32 %v1604_v0  ;;  %v1227_v0 = vrot.slane %v1225_v45, 1 }
 0x541   :  { %v1231_v46 = vsub.f32 %v3385_v12, %v1227_v0  ;;  %v2328_v12 = vld [vmem:[%s3653_s2 + $0x4] sm:$0x1] }
 0x542   :  { %vm2330_vm1 = vcmp.gt.f32.partialorder %v2328_v12, 0.0 }
 0x54a   :  { %v3558_v2 = vpop.eup %2776 }
 0x54b   :  { %v2779_v32 = vpop.eup %2778  ;;  %v1610_v26 = vrot.slane %v3558_v2, 7 }
 0x54c   :  { %v854_v18 = vsel %vm834_vm7, %v853_v63, %v2779_v32  ;;  %v2781_v8 = vpop.eup %2780 }
 0x54d   :  { %v856_v59 = vsel %vm837_vm8, %v854_v18, 0.0  ;;  %v1611_v9 = vsel %vm834_vm7, %v1610_v26, %v2781_v8 }
 0x54e   :  { %v1613_v62 = vsel %vm837_vm8, %v1611_v9, 0.0 }
 0x5b2   :  { %v1880_v48 = vpop.f32.mrf.mxu0 }
 0x5b3   :  { %v3560_v5 = vsel %vm1958_vm14, -1e+30, %v1880_v48  ;;  %v1234_v48 = vmul.f32 1.442695, %v1231_v46 }
 0x5b4   :  { %v2692_v50 = vpop.f32.mrf.mxu0  ;;  %v1952_v51 = vpop.f32.mrf.mxu1 }
 0x5b5   :  { %v3554_v52 = vsel %vm1959_vm13, -1e+30, %v1952_v51  ;;  %v1230_v50 = vsub.f32 %v3388_v19, %v1225_v45 }
 0x5b6   :  { %v1964_v53 = vrot.slane %v3554_v52, 7  ;;  %v2699_v54 = vpop.f32.mrf.mxu1 }
 0x5b8   :  { %v1965_v6 = vsel %vm834_vm7, %v1964_v53, %v3560_v5  ;;  %v1232_v53 = vmul.f32 1.442695, %v1230_v50 }
 0x5b9   :  { %v1967_v56 = vsel %vm837_vm8, %v1965_v6, -inf }
 0x5ba   :  { %1968 = vmax.xlane.f32.xlu1 %v1967_v56 }
 0x5be   :  { %857 = vadd.xlane.f32.xlu1 %v856_v59 }
 0x5c0   :  { %v2065_v61 = vpop.f32.mrf.mxu0 }
 0x5c1   :  { %v2066_v25 = vadd.f32 %v2065_v61, %v3203_v16 }
 0x5c2   :  { %v2067_v4 = vpop.f32.mrf.mxu0  ;;  %1614 = vadd.xlane.f32.xlu1 %v1613_v62 }
 0x5c3   :  { %v2140_v7 = vadd.f32 %v2066_v25, %v3300_v1  ;;  %v2136_v11 = vpop.f32.mrf.mxu1  ;;  %v2068_v10 = vadd.f32 %v2067_v4, %v3206_v22 }
 0x5c4   :  { %v2137_v20 = vadd.f32 %v2136_v11, %v3213_v60 }
 0x5c5   :  { %v2440_v17 = vmul.f32 -1.442695, %v2140_v7  ;;  %v2716_v23 = vpop.f32.mrf.mxu1  ;;  %v2147_v15 = vadd.f32 %v2068_v10, %v3307_v21 }
 0x5c7   :  { %2782 = vpow2.f32 %v2440_v17  ;;  %v2441_v3 = vmul.f32 -1.442695, %v2147_v15 }
 0x5c9   :  { %2784 = vpow2.f32 %v2441_v3 }
 0x5d4   :  { %v2783_v55 = vpop.eup %2782 }
 0x5d5   :  { %v2144_v24 = vadd.f32 1.0, %v2783_v55 }
 0x5d6   :  { %v2785_v16 = vpop.eup %2784 }
 0x5d7   :  { %2786 = vrcp.f32 %v2144_v24  ;;  %v2151_v14 = vadd.f32 1.0, %v2785_v16 }
 0x5d9   :  { %2788 = vrcp.f32 %v2151_v14 }
 0x5e4   :  { %v2787_v27 = vpop.eup %2786 }
 0x5e5   :  { %v2154_v1 = vmul.f32 %v2787_v27, %v2137_v20 }
 0x5e6   :  { %v2789_v22 = vpop.eup %2788 }
 0x5e7   :  { %v2155_v34 = vadd.f32 %v2154_v1, %v3313_v28  ;;  %v2157_v57 = vsub.f32 1.0, %v2789_v22  ;;  %v2159_v21 = vmul.f32 %v2789_v22, %v3483_v29 }
 0x5e9   :  { %2790 = vtanh.f32 %v2155_v34 }
 0x5f6   :  { %v2791_v30 = vpop.eup %2790 }
 0x5f7   :  { %v2158_v31 = vmul.f32 %v2791_v30, %v2157_v57 }
 0x5f9   :  { %v2160_v33 = vadd.f32 %v2159_v21, %v2158_v31 }
 0x5fb   :  { %v2168_v58 = vrot.slane %v2160_v33, %v3219_v13 }
 0x5fd   :  { %v2176_v35 = vrot.slane %v2168_v58, %v3219_v13  ;;  %v2169_v36 = vcombine.high %v2168_v58, %v2168_v58 }
 0x5ff   :  { %2722 = vmatmul.mubr.msk.f32.vlgmr.msra.gmra.mxu0 %vm269_vm3, %v2176_v35  ;;  %v2183_v60 = vrot.slane %v2169_v36, %v3219_v13 }
 0x601   :  { %2729 = vmatmul.mubr.msk.f32.vlgmr.msra.gmra.mxu1 %vm269_vm3, %v2183_v60 }
 0x643   :  { %v1969_v28 = vpop.xlane.xlu1 %1968 }
 0x644   :  { %v1971_v47 = vrot.slane %v1969_v28, 1  ;;  %v1974_v54 = vsub.f32 %v3560_v5, %v1969_v28 }
 0x646   :  { %v1976_v63 = vmul.f32 1.442695, %v1974_v54 }
 0x647   :  { %v858_v37 = vpop.xlane.xlu1 %857 }
 0x648   :  { %2792 = vrcp.f32 %v858_v37 }
 0x64b   :  { %v1615_v38 = vpop.xlane.xlu1 %1614 }
 0x64c   :  { %2794 = vrcp.f32 %v1615_v38 }
 0x64d   :  { %2796 = vpow2.f32 %v1234_v48 }
 0x655   :  { %v2793_v39 = vpop.eup %2792 }
 0x656   :  { %v861_v29 = vrot.slane %v2793_v39, 1  ;;  %v864_v40 = vmul.f32 %v2793_v39, %v2779_v32 }
 0x658   :  { %v865_v42 = vmul.f32 %v3552_v49, %v861_v29  ;;  %867 = vst.msk [vmem:[%s3654_s12] sm:$0x1] %vm866_vm15, %v864_v40  ;;  %v1975_v49 = vsub.f32 %v3554_v52, %v1971_v47 }
 0x659   :  { %v2795_v41 = vpop.eup %2794 }
 0x65a   :  { %v1618_v13 = vrot.slane %v2795_v41, 1  ;;  %v1621_v43 = vmul.f32 %v2795_v41, %v2781_v8  ;;  %868 = vst.msk [vmem:[%s3654_s12 + $0x8] sm:$0x1] %vm866_vm15, %v865_v42  ;;  %v1978_v51 = vmul.f32 1.442695, %v1975_v49  ;;  %v2797_v19 = vpop.eup %2796 }
 0x65b   :  { %v1238_v26 = vrot.slane %v2797_v19, 7 }
 0x65c   :  { %v1622_v44 = vmul.f32 %v3558_v2, %v1618_v13  ;;  %1623 = vst.msk [vmem:[%s3654_s12 + $0x2] sm:$0x1] %vm866_vm15, %v1621_v43  ;;  %2798 = vpow2.f32 %v1978_v51  ;;  %v2329_v2 = vld [vmem:[%s3653_s2 + $0xc] sm:$0x1] }
 0x65d   :  { %2800 = vpow2.f32 %v1232_v53  ;;  %vm2331_vm0 = vcmp.gt.f32.partialorder %v2329_v2, 0.0 }
 0x65e   :  { %1624 = vst.msk [vmem:[%s3654_s12 + $0xa] sm:$0x1] %vm866_vm15, %v1622_v44  ;;  %2802 = vpow2.f32 %v1976_v63 }
 0x669   :  { %v2799_v8 = vpop.eup %2798 }
 0x66a   :  { %v2801_v61 = vpop.eup %2800  ;;  %v1982_v4 = vrot.slane %v2799_v8, 7 }
 0x66b   :  { %v1239_v62 = vsel %vm834_vm7, %v1238_v26, %v2801_v61  ;;  %v2803_v7 = vpop.eup %2802 }
 0x66c   :  { %v1241_v11 = vsel %vm837_vm8, %v1239_v62, 0.0  ;;  %v1983_v17 = vsel %vm834_vm7, %v1982_v4, %v2803_v7 }
 0x66d   :  { %v1985_v10 = vsel %vm837_vm8, %v1983_v17, 0.0 }
 0x6bf   :  { %v2252_v52 = vpop.f32.mrf.mxu0 }
 0x6c0   :  { %v2332_v59 = vsel %vm2330_vm1, -1e+30, %v2252_v52 }
 0x6c1   :  { %v2723_v6 = vpop.f32.mrf.mxu0  ;;  %v2324_v32 = vpop.f32.mrf.mxu1 }
 0x6c2   :  { %v2333_v56 = vsel %vm2331_vm0, -1e+30, %v2324_v32 }
 0x6c3   :  { %v2336_v5 = vrot.slane %v2333_v56, 7  ;;  %v2730_v18 = vpop.f32.mrf.mxu1 }
 0x6c5   :  { %v2337_v9 = vsel %vm834_vm7, %v2336_v5, %v2332_v59 }
 0x6c6   :  { %v2339_v25 = vsel %vm837_vm8, %v2337_v9, -inf }
 0x6c7   :  { %2340 = vmax.xlane.f32.xlu0 %v2339_v25 }
 0x6cb   :  { %1242 = vadd.xlane.f32.xlu0 %v1241_v11 }
 0x6cf   :  { %1986 = vadd.xlane.f32.xlu0 %v1985_v10 }
 0x750   :  { %v2341_v23 = vpop.xlane.xlu0 %2340 }
 0x751   :  { %v2343_v15 = vrot.slane %v2341_v23, 1  ;;  %v2346_v3 = vsub.f32 %v2332_v59, %v2341_v23 }
 0x753   :  { %v2347_v55 = vsub.f32 %v2333_v56, %v2343_v15  ;;  %v2348_v24 = vmul.f32 1.442695, %v2346_v3 }
 0x754   :  { %v1243_v16 = vpop.xlane.xlu0 %1242 }
 0x755   :  { %v2350_v14 = vmul.f32 1.442695, %v2347_v55  ;;  %2804 = vrcp.f32 %v1243_v16 }
 0x757   :  { %2806 = vpow2.f32 %v2350_v14 }
 0x758   :  { %2808 = vpow2.f32 %v2348_v24  ;;  %v1987_v20 = vpop.xlane.xlu0 %1986 }
 0x759   :  { %2810 = vrcp.f32 %v1987_v20 }
 0x762   :  { %v2805_v27 = vpop.eup %2804 }
 0x763   :  { %v1246_v34 = vrot.slane %v2805_v27, 1  ;;  %v1249_v22 = vmul.f32 %v2805_v27, %v2801_v61 }
 0x764   :  { %v2807_v1 = vpop.eup %2806 }
 0x765   :  { %v2809_v57 = vpop.eup %2808  ;;  %v2354_v30 = vrot.slane %v2807_v1, 7  ;;  %v1250_v21 = vmul.f32 %v2797_v19, %v1246_v34  ;;  %1251 = vst.msk [vmem:[%s3654_s12 + $0x1] sm:$0x1] %vm866_vm15, %v1249_v22 }
 0x766   :  { %v2811_v31 = vpop.eup %2810 }
 0x767   :  { %v1990_v33 = vrot.slane %v2811_v31, 1  ;;  %v1993_v58 = vmul.f32 %v2811_v31, %v2803_v7  ;;  %v2355_v35 = vsel %vm834_vm7, %v2354_v30, %v2809_v57  ;;  %1252 = vst.msk [vmem:[%s3654_s12 + $0x9] sm:$0x1] %vm866_vm15, %v1250_v21 }
 0x768   :  { %v2357_v36 = vsel %vm837_vm8, %v2355_v35, 0.0 }
 0x769   :  { %v1994_v60 = vmul.f32 %v2799_v8, %v1990_v33  ;;  %1995 = vst.msk [vmem:[%s3654_s12 + $0x3] sm:$0x1] %vm866_vm15, %v1993_v58  ;;  %2358 = vadd.xlane.f32.xlu1 %v2357_v36 }
 0x76b   :  { %1996 = vst.msk [vmem:[%s3654_s12 + $0xb] sm:$0x1] %vm866_vm15, %v1994_v60 }
 0x7f2   :  { %v2359_v28 = vpop.xlane.xlu1 %2358 }
 0x7f3   :  { %2812 = vrcp.f32 %v2359_v28 }
 0x800   :  { %v2813_v37 = vpop.eup %2812 }
 0x801   :  { %v2362_v38 = vrot.slane %v2813_v37, 1  ;;  %v2365_v39 = vmul.f32 %v2813_v37, %v2809_v57 }
 0x803   :  { %v2366_v29 = vmul.f32 %v2807_v1, %v2362_v38  ;;  %2367 = vst.msk [vmem:[%s3654_s12 + $0x4] sm:$0x1] %vm866_vm15, %v2365_v39 }
 0x805   :  { %2368 = vst.msk [vmem:[%s3654_s12 + $0xc] sm:$0x1] %vm866_vm15, %v2366_v29 }

</bundles_post_ra>
